<compile_context>
chip_gen: v7x
topology: tpu7x:2x2x1
jax: 0.10.0
libtpu: 0.0.40
codegen_flags: <defaults>
</compile_context>

<pallas_src>
import functools

import jax
import jax.numpy as jnp
from jax.experimental import pallas as pl
from jax.experimental.pallas import tpu as pltpu

BN_EPS = 1e-5
LANE = 128
SUBLANE = 8


def _round_up(x, m):
    return ((x + m - 1) // m) * m


def _pad2(x, rows, cols, fill=0.0):
    return jnp.pad(
        x, ((0, rows - x.shape[0]), (0, cols - x.shape[1])),
        constant_values=fill)


def _fold8(x):
    """Fold (R, C) -> (8, C) with sublane-aligned static slices (VPU adds only)."""
    acc = x[0:SUBLANE, :]
    for i in range(1, x.shape[0] // SUBLANE):
        acc = acc + x[i * SUBLANE:(i + 1) * SUBLANE, :]
    return acc


def _multitask_kernel(h_ref, y_ref, w1_ref, b1_ref, g_ref, be_ref,
                      w2_ref, b2_ref, out_ref,
                      sum_ref, sq_ref, shift_ref, num_ref, den_ref, zc_ref,
                      *, n_real, tile_n, cache_z):
    p = pl.program_id(0)          # 0 = BN-stats pass, 1 = loss pass
    t = pl.program_id(1)          # batch tile index
    nt = pl.num_programs(1)
    inv_n = jnp.float32(1.0 / float(n_real))

    def _linear1():
        # MXU: bf16 operands, f32 accumulation.
        return jnp.dot(h_ref[...], w1_ref[...],
                       preferred_element_type=jnp.float32) + b1_ref[...]

    # ---- Pass 0: BatchNorm batch statistics (shifted sums, real rows only). --
    @pl.when(p == 0)
    def _stats():
        z = _linear1()

        @pl.when(t == 0)
        def _init():
            shift_ref[...] = z[0:1, :]      # per-column shift = first real row
            sum_ref[...] = jnp.zeros_like(sum_ref)
            sq_ref[...] = jnp.zeros_like(sq_ref)
            num_ref[...] = jnp.zeros_like(num_ref)
            den_ref[...] = jnp.zeros_like(den_ref)

        if cache_z:
            r0 = pl.multiple_of(t * tile_n, tile_n)
            zc_ref[pl.ds(r0, tile_n), :] = z

        row = (jax.lax.broadcasted_iota(jnp.int32, (tile_n, 1), 0)
               + t * tile_n)
        row_mask = (row < n_real).astype(jnp.float32)       # (TN, 1)
        zs = z - shift_ref[...]
        zm = zs * row_mask
        sum_ref[...] += _fold8(zm)
        sq_ref[...] += _fold8(zm * zs)

    # ---- Pass 1: normalize, ReLU, Linear 2, masked BCE accumulation. --------
    @pl.when(p == 1)
    def _loss():
        if cache_z:
            r0 = pl.multiple_of(t * tile_n, tile_n)
            z = zc_ref[pl.ds(r0, tile_n), :]
        else:
            z = _linear1()

        s = jnp.sum(sum_ref[...], axis=0, keepdims=True)     # (1, H_p)
        q = jnp.sum(sq_ref[...], axis=0, keepdims=True)
        mean_c = s * inv_n                                    # mean of z - shift
        var = jnp.maximum(q * inv_n - mean_c * mean_c, 0.0)   # biased variance
        mean = shift_ref[...] + mean_c
        zn = (z - mean) * jax.lax.rsqrt(var + BN_EPS) * g_ref[...] + be_ref[...]
        a = jnp.maximum(zn, 0.0)

        logits = jnp.dot(a.astype(jnp.bfloat16), w2_ref[...],
                         preferred_element_type=jnp.float32) + b2_ref[...]

        y = y_ref[...]
        mask = (y >= 0.0).astype(jnp.float32)   # absorbs row + task padding
        bce = (jnp.maximum(logits, 0.0) - logits * y
               + jnp.log1p(jnp.exp(-jnp.abs(logits))))
        num_ref[...] += _fold8(bce * mask)
        den_ref[...] += _fold8(mask)

        # ---- Finalize: single reduce-to-scalar + SMEM write. ----------------
        @pl.when(t == nt - 1)
        def _finalize():
            out_ref[0, 0] = jnp.sum(num_ref[...])
            out_ref[0, 1] = jnp.sum(den_ref[...])


def _vmem_capacity_bytes():
    try:
        return int(pltpu.get_tpu_info().vmem_capacity_bytes)
    except Exception:
        return 64 * 1024 * 1024      # conservative (v7x-sized) fallback


def multitask_cls_loss(h_g, y, params, *, tile_n=None):
    """Masked mean BCE-with-logits loss of the MultiTaskCls head."""
    N, D = h_g.shape
    T = y.shape[1]
    H = params["w1"].shape[1]

    # Lane-dense padding (last dims -> multiples of 128).
    D_p = _round_up(D, LANE)
    H_p = _round_up(H, LANE)
    T_p = _round_up(T, LANE)

    # ---- Per-generation tile / VMEM budgeting. -------------------------------
    cap = _vmem_capacity_bytes()
    budget = (cap * 3) // 4
    if tile_n is None:
        tile_n = 512 if cap >= (100 << 20) else 256   # v5e/v6e vs v7x
    TN = _round_up(min(tile_n, _round_up(N, 16)), 16)  # bf16 packs (16, 128)
    N_p = _round_up(N, TN)
    num_tiles = N_p // TN

    def _vmem_need(cache):
        b = 2 * TN * D_p * 2                       # h tile, double-buffered bf16
        b += 2 * TN * T_p * 4                      # y tile, double-buffered f32
        b += 2 * (D_p * H_p * 2 + H_p * T_p * 2)   # w1 / w2 (conservative 2x)
        b += 2 * (3 * H_p * 4 + T_p * 4)           # b1 / gamma / beta / b2
        b += 2 * SUBLANE * H_p * 4                 # sum / sq accumulators
        b += H_p * 4                               # shift
        b += 2 * SUBLANE * T_p * 4                 # BCE num / den accumulators
        if cache:
            b += N_p * H_p * 4                     # cached z
        return b

    cache_z = _vmem_need(True) <= budget
    need = _vmem_need(cache_z)
    vmem_limit = max(int(need * 1.4) + (2 << 20), 16 << 20)
    vmem_limit = int(min(vmem_limit, (cap * 7) // 8))

    # bf16 MXU operands; f32 everywhere else. Padded labels = -1 -> masked.
    h_pad = _pad2(h_g.astype(jnp.float32), N_p, D_p, 0.0).astype(jnp.bfloat16)
    y_pad = _pad2(y.astype(jnp.float32), N_p, T_p, -1.0)
    w1_p = _pad2(params["w1"], D_p, H_p, 0.0).astype(jnp.bfloat16)
    b1_p = _pad2(params["b1"], 1, H_p, 0.0)
    g_p = _pad2(params["gamma"], 1, H_p, 1.0)
    be_p = _pad2(params["beta"], 1, H_p, 0.0)
    w2_p = _pad2(params["w2"], H_p, T_p, 0.0).astype(jnp.bfloat16)
    b2_p = _pad2(params["b2"], 1, T_p, 0.0)

    kernel = functools.partial(
        _multitask_kernel, n_real=N, tile_n=TN, cache_z=cache_z)

    # h is only needed in pass 1 when z is not cached; y only in pass 1.
    h_map = (lambda p, t: (t * (1 - p), 0)) if cache_z else (lambda p, t: (t, 0))
    y_map = lambda p, t: (t * p, 0)

    cost = pl.CostEstimate(
        flops=2 * N_p * D_p * H_p * (1 if cache_z else 2) + 2 * N_p * H_p * T_p,
        transcendentals=2 * N_p * T_p,
        bytes_accessed=N_p * D_p * 2 * (1 if cache_z else 2)
        + N_p * T_p * 4 + D_p * H_p * 2 + H_p * T_p * 2 + 16 * (H_p + T_p),
    )

    def _run(single_buffer_weights):
        res_kw = ({"pipeline_mode": pl.Buffered(1)}
                  if single_buffer_weights else {})
        call = pl.pallas_call(
            kernel,
            out_shape=jax.ShapeDtypeStruct((1, 2), jnp.float32),
            grid_spec=pltpu.PrefetchScalarGridSpec(
                num_scalar_prefetch=0,
                grid=(2, num_tiles),
                in_specs=[
                    pl.BlockSpec((TN, D_p), h_map),                         # h
                    pl.BlockSpec((TN, T_p), y_map),                         # y
                    pl.BlockSpec((D_p, H_p), lambda p, t: (0, 0), **res_kw),  # w1
                    pl.BlockSpec((1, H_p), lambda p, t: (0, 0), **res_kw),    # b1
                    pl.BlockSpec((1, H_p), lambda p, t: (0, 0), **res_kw),    # gamma
                    pl.BlockSpec((1, H_p), lambda p, t: (0, 0), **res_kw),    # beta
                    pl.BlockSpec((H_p, T_p), lambda p, t: (0, 0), **res_kw),  # w2
                    pl.BlockSpec((1, T_p), lambda p, t: (0, 0), **res_kw),    # b2
                ],
                out_specs=pl.BlockSpec(memory_space=pltpu.MemorySpace.SMEM),
                scratch_shapes=[
                    pltpu.VMEM((SUBLANE, H_p), jnp.float32),   # sum(z - shift)
                    pltpu.VMEM((SUBLANE, H_p), jnp.float32),   # sum((z-shift)^2)
                    pltpu.VMEM((1, H_p), jnp.float32),         # shift
                    pltpu.VMEM((SUBLANE, T_p), jnp.float32),   # BCE numerator
                    pltpu.VMEM((SUBLANE, T_p), jnp.float32),   # BCE denominator
                    pltpu.VMEM((N_p if cache_z else SUBLANE, H_p),
                               jnp.float32),                   # z cache / dummy
                ],
            ),
            compiler_params=pltpu.CompilerParams(
                # TODO(synk): v7x dual-TC split of the tile axis (per-core
                # partial stats + cross-core combine).
                dimension_semantics=("arbitrary", "arbitrary"),
                vmem_limit_bytes=vmem_limit,
            ),
            cost_estimate=cost,
        )
        out = call(h_pad, y_pad, w1_p, b1_p, g_p, be_p, w2_p, b2_p)
        return jax.block_until_ready(out)

    try:
        num_den = _run(True)
    except Exception:
        # Fallback for jax versions without BlockSpec pipeline_mode support.
        num_den = _run(False)

    num = num_den[0, 0]
    den = jnp.maximum(num_den[0, 1], 1.0)   # guard: all labels masked
    return num / den


# ---------------------------------------------------------------------------
# Pure-JAX reference (f32) for validation.
# ---------------------------------------------------------------------------
def reference_loss(h_g, y, params):
    z = h_g @ params["w1"] + params["b1"]
    mean = jnp.mean(z, axis=0, keepdims=True)
    var = jnp.mean((z - mean) ** 2, axis=0, keepdims=True)
    a = jnp.maximum(
        (z - mean) / jnp.sqrt(var + BN_EPS) * params["gamma"] + params["beta"],
        0.0)
    logits = a @ params["w2"] + params["b2"]
    mask = (y >= 0.0).astype(jnp.float32)
    bce = (jnp.maximum(logits, 0.0) - logits * y
           + jnp.log1p(jnp.exp(-jnp.abs(logits))))
    return jnp.sum(bce * mask) / jnp.maximum(jnp.sum(mask), 1.0)


def xavier_uniform(key, shape):
    fan_in, fan_out = shape
    bound = (6.0 / (fan_in + fan_out)) ** 0.5
    return jax.random.uniform(key, shape, jnp.float32, -bound, bound)


def init_params(key, in_dim, hidden_dim, num_task):
    k1, k2 = jax.random.split(key)
    # PyTorch Linear stores weight as (out, in); we keep the (in, out)
    # transpose for row-major matmul (xavier bound is symmetric).
    return {
        "w1": xavier_uniform(k1, (in_dim, hidden_dim)),
        "b1": jnp.zeros((1, hidden_dim), jnp.float32),
        "gamma": jnp.ones((1, hidden_dim), jnp.float32),
        "beta": jnp.zeros((1, hidden_dim), jnp.float32),
        "w2": xavier_uniform(k2, (hidden_dim, num_task)),
        "b2": jnp.zeros((1, num_task), jnp.float32),
    }


if __name__ == "__main__":
    N, IN_DIM, HIDDEN, NUM_TASK = 8, 32, 32, 8

    root = jax.random.PRNGKey(0)
    k_param, k_x, k_y = jax.random.split(root, 3)

    params = init_params(k_param, IN_DIM, HIDDEN, NUM_TASK)
    h_g = jax.random.normal(k_x, (N, IN_DIM), jnp.float32)
    # labels in {-1, 0, 1}; -1 marks missing task labels (masked out)
    y = jax.random.randint(k_y, (N, NUM_TASK), -1, 2).astype(jnp.float32)

    loss = multitask_cls_loss(h_g, y, params)
    loss = jax.block_until_ready(loss)

    ref = reference_loss(h_g, y, params)

    assert loss.shape == () and bool(jnp.isfinite(loss))
    # bf16 MXU inputs (f32 accumulate) -> relaxed tolerance vs f32 reference.
    assert abs(float(loss) - float(ref)) <= 5e-2 * abs(float(ref)) + 1e-2, (
        float(loss), float(ref))
    print("KERNEL_OK")
</pallas_src>

<mosaic_0001>
module attributes {stable_mosaic.version = 11 : i64} {
  func.func @_multitask_kernel(%arg0: i32, %arg1: i32, %arg2: memref<16x128xbf16, #tpu.memory_space<vmem>>, %arg3: memref<16x128xf32, #tpu.memory_space<vmem>>, %arg4: memref<128x128xbf16, #tpu.memory_space<vmem>>, %arg5: memref<1x128xf32, #tpu.memory_space<vmem>>, %arg6: memref<1x128xf32, #tpu.memory_space<vmem>>, %arg7: memref<1x128xf32, #tpu.memory_space<vmem>>, %arg8: memref<128x128xbf16, #tpu.memory_space<vmem>>, %arg9: memref<1x128xf32, #tpu.memory_space<vmem>>, %arg10: memref<1x2xf32, #tpu.memory_space<smem>>, %arg11: memref<8x128xf32, #tpu.memory_space<vmem>>, %arg12: memref<8x128xf32, #tpu.memory_space<vmem>>, %arg13: memref<1x128xf32, #tpu.memory_space<vmem>>, %arg14: memref<8x128xf32, #tpu.memory_space<vmem>>, %arg15: memref<8x128xf32, #tpu.memory_space<vmem>>, %arg16: memref<16x128xf32, #tpu.memory_space<vmem>>) attributes {dimension_semantics = [#tpu.dimension_semantics<arbitrary>, #tpu.dimension_semantics<arbitrary>], iteration_bounds = array<i64: 2, 1>, scalar_prefetch = 0 : i64, scratch_operands = 6 : i64, tpu.core_type = #tpu.core_type<tc>, window_params = [{transform_indices = @transform_0, window_bounds = array<i64: 16, 128>}, {transform_indices = @transform_1, window_bounds = array<i64: 16, 128>}, {pipeline_mode = #tpu.pipeline_mode<synchronous>, transform_indices = @transform_2, window_bounds = array<i64: 128, 128>}, {pipeline_mode = #tpu.pipeline_mode<synchronous>, transform_indices = @transform_3, window_bounds = array<i64: 1, 128>}, {pipeline_mode = #tpu.pipeline_mode<synchronous>, transform_indices = @transform_4, window_bounds = array<i64: 1, 128>}, {pipeline_mode = #tpu.pipeline_mode<synchronous>, transform_indices = @transform_5, window_bounds = array<i64: 1, 128>}, {pipeline_mode = #tpu.pipeline_mode<synchronous>, transform_indices = @transform_6, window_bounds = array<i64: 128, 128>}, {pipeline_mode = #tpu.pipeline_mode<synchronous>, transform_indices = @transform_7, window_bounds = array<i64: 1, 128>}, {transform_indices = @transform_8, window_bounds = array<i64: 1, 2>}]} {
    %c0_i32 = arith.constant 0 : i32
    %0 = arith.cmpi eq, %arg0, %c0_i32 : i32
    %1 = arith.extui %0 : i1 to i32
    %c0_i32_0 = arith.constant 0 : i32
    %2 = arith.cmpi ne, %1, %c0_i32_0 : i32
    scf.if %2 {
      %c0 = arith.constant 0 : index
      %c0_2 = arith.constant 0 : index
      %6 = vector.load %arg2[%c0, %c0_2] : memref<16x128xbf16, #tpu.memory_space<vmem>>, vector<16x128xbf16>
      %c0_3 = arith.constant 0 : index
      %c0_4 = arith.constant 0 : index
      %7 = vector.load %arg4[%c0_3, %c0_4] : memref<128x128xbf16, #tpu.memory_space<vmem>>, vector<128x128xbf16>
      %cst_5 = arith.constant dense<0.000000e+00> : vector<16x128xf32>
      %8 = tpu.matmul %6, %7, %cst_5 {dimension_numbers = #tpu.dot_dimension_numbers<[1], [0], [0], [1], [0, 0, 1, 1], [], []>} : vector<16x128xbf16>, vector<128x128xbf16>, vector<16x128xf32> -> vector<16x128xf32>
      %c0_6 = arith.constant 0 : index
      %c0_7 = arith.constant 0 : index
      %9 = vector.load %arg5[%c0_6, %c0_7] : memref<1x128xf32, #tpu.memory_space<vmem>>, vector<1x128xf32>
      %10 = vector.broadcast %9 : vector<1x128xf32> to vector<16x128xf32>
      %11 = arith.addf %8, %10 : vector<16x128xf32>
      %c0_i32_8 = arith.constant 0 : i32
      %12 = arith.cmpi eq, %arg1, %c0_i32_8 : i32
      %13 = arith.extui %12 : i1 to i32
      %c0_i32_9 = arith.constant 0 : i32
      %14 = arith.cmpi ne, %13, %c0_i32_9 : i32
      scf.if %14 {
        %45 = vector.extract_strided_slice %11 {offsets = [0, 0], sizes = [1, 128], strides = [1, 1]} : vector<16x128xf32> to vector<1x128xf32>
        %c0_22 = arith.constant 0 : index
        %c0_23 = arith.constant 0 : index
        %46 = vector.load %arg13[%c0_22, %c0_23] : memref<1x128xf32, #tpu.memory_space<vmem>>, vector<1x128xf32>
        tpu.vector_store %arg13[%c0_22, %c0_23], %45 {strides = array<i32>} : memref<1x128xf32, #tpu.memory_space<vmem>>, vector<1x128xf32>,
        %cst_24 = arith.constant 0.000000e+00 : f32
        %47 = vector.broadcast %cst_24 : f32 to vector<8x128xf32>
        %c0_25 = arith.constant 0 : index
        %c0_26 = arith.constant 0 : index
        %48 = vector.load %arg11[%c0_25, %c0_26] : memref<8x128xf32, #tpu.memory_space<vmem>>, vector<8x128xf32>
        tpu.vector_store %arg11[%c0_25, %c0_26], %47 {strides = array<i32>} : memref<8x128xf32, #tpu.memory_space<vmem>>, vector<8x128xf32>,
        %cst_27 = arith.constant 0.000000e+00 : f32
        %49 = vector.broadcast %cst_27 : f32 to vector<8x128xf32>
        %c0_28 = arith.constant 0 : index
        %c0_29 = arith.constant 0 : index
        %50 = vector.load %arg12[%c0_28, %c0_29] : memref<8x128xf32, #tpu.memory_space<vmem>>, vector<8x128xf32>
        tpu.vector_store %arg12[%c0_28, %c0_29], %49 {strides = array<i32>} : memref<8x128xf32, #tpu.memory_space<vmem>>, vector<8x128xf32>,
        %cst_30 = arith.constant 0.000000e+00 : f32
        %51 = vector.broadcast %cst_30 : f32 to vector<8x128xf32>
        %c0_31 = arith.constant 0 : index
        %c0_32 = arith.constant 0 : index
        %52 = vector.load %arg14[%c0_31, %c0_32] : memref<8x128xf32, #tpu.memory_space<vmem>>, vector<8x128xf32>
        tpu.vector_store %arg14[%c0_31, %c0_32], %51 {strides = array<i32>} : memref<8x128xf32, #tpu.memory_space<vmem>>, vector<8x128xf32>,
        %cst_33 = arith.constant 0.000000e+00 : f32
        %53 = vector.broadcast %cst_33 : f32 to vector<8x128xf32>
        %c0_34 = arith.constant 0 : index
        %c0_35 = arith.constant 0 : index
        %54 = vector.load %arg15[%c0_34, %c0_35] : memref<8x128xf32, #tpu.memory_space<vmem>>, vector<8x128xf32>
        tpu.vector_store %arg15[%c0_34, %c0_35], %53 {strides = array<i32>} : memref<8x128xf32, #tpu.memory_space<vmem>>, vector<8x128xf32>,
      } else {
      }
      %c16_i32 = arith.constant 16 : i32
      %15 = arith.muli %arg1, %c16_i32 : i32
      %16 = tpu.assume_multiple %15, 16 : i32
      %17 = arith.index_cast %16 : i32 to index
      %c0_10 = arith.constant 0 : index
      %18 = vector.load %arg16[%17, %c0_10] : memref<16x128xf32, #tpu.memory_space<vmem>>, vector<16x128xf32>
      tpu.vector_store %arg16[%17, %c0_10], %11 {strides = array<i32>} : memref<16x128xf32, #tpu.memory_space<vmem>>, vector<16x128xf32>,
      %19 = tpu.iota {dimensions = array<i32: 0>} : vector<16x1xi32>
      %c16_i32_11 = arith.constant 16 : i32
      %20 = arith.muli %arg1, %c16_i32_11 : i32
      %21 = vector.broadcast %20 : i32 to vector<16x1xi32>
      %22 = arith.addi %19, %21 : vector<16x1xi32>
      %c8_i32 = arith.constant 8 : i32
      %23 = vector.broadcast %c8_i32 : i32 to vector<16x1xi32>
      %24 = arith.cmpi slt, %22, %23 : vector<16x1xi32>
      %25 = arith.extui %24 : vector<16x1xi1> to vector<16x1xi32>
      %26 = arith.sitofp %25 : vector<16x1xi32> to vector<16x1xf32>
      %c0_12 = arith.constant 0 : index
      %c0_13 = arith.constant 0 : index
      %27 = vector.load %arg13[%c0_12, %c0_13] : memref<1x128xf32, #tpu.memory_space<vmem>>, vector<1x128xf32>
      %28 = vector.broadcast %27 : vector<1x128xf32> to vector<16x128xf32>
      %29 = arith.subf %11, %28 : vector<16x128xf32>
      %30 = vector.broadcast %26 : vector<16x1xf32> to vector<16x128xf32>
      %31 = arith.mulf %29, %30 : vector<16x128xf32>
      %c0_14 = arith.constant 0 : index
      %c0_15 = arith.constant 0 : index
      %32 = vector.load %arg11[%c0_14, %c0_15] : memref<8x128xf32, #tpu.memory_space<vmem>>, vector<8x128xf32>
      %33 = vector.extract_strided_slice %31 {offsets = [0, 0], sizes = [8, 128], strides = [1, 1]} : vector<16x128xf32> to vector<8x128xf32>
      %34 = vector.extract_strided_slice %31 {offsets = [8, 0], sizes = [8, 128], strides = [1, 1]} : vector<16x128xf32> to vector<8x128xf32>
      %35 = arith.addf %33, %34 : vector<8x128xf32>
      %36 = arith.addf %32, %35 : vector<8x128xf32>
      %c0_16 = arith.constant 0 : index
      %c0_17 = arith.constant 0 : index
      %37 = vector.load %arg11[%c0_16, %c0_17] : memref<8x128xf32, #tpu.memory_space<vmem>>, vector<8x128xf32>
      tpu.vector_store %arg11[%c0_16, %c0_17], %36 {strides = array<i32>} : memref<8x128xf32, #tpu.memory_space<vmem>>, vector<8x128xf32>,
      %c0_18 = arith.constant 0 : index
      %c0_19 = arith.constant 0 : index
      %38 = vector.load %arg12[%c0_18, %c0_19] : memref<8x128xf32, #tpu.memory_space<vmem>>, vector<8x128xf32>
      %39 = arith.mulf %31, %29 : vector<16x128xf32>
      %40 = vector.extract_strided_slice %39 {offsets = [0, 0], sizes = [8, 128], strides = [1, 1]} : vector<16x128xf32> to vector<8x128xf32>
      %41 = vector.extract_strided_slice %39 {offsets = [8, 0], sizes = [8, 128], strides = [1, 1]} : vector<16x128xf32> to vector<8x128xf32>
      %42 = arith.addf %40, %41 : vector<8x128xf32>
      %43 = arith.addf %38, %42 : vector<8x128xf32>
      %c0_20 = arith.constant 0 : index
      %c0_21 = arith.constant 0 : index
      %44 = vector.load %arg12[%c0_20, %c0_21] : memref<8x128xf32, #tpu.memory_space<vmem>>, vector<8x128xf32>
      tpu.vector_store %arg12[%c0_20, %c0_21], %43 {strides = array<i32>} : memref<8x128xf32, #tpu.memory_space<vmem>>, vector<8x128xf32>,
    } else {
    }
    %c1_i32 = arith.constant 1 : i32
    %3 = arith.cmpi eq, %arg0, %c1_i32 : i32
    %4 = arith.extui %3 : i1 to i32
    %cst = arith.constant 1.250000e-01 : f32
    %c0_i32_1 = arith.constant 0 : i32
    %5 = arith.cmpi ne, %4, %c0_i32_1 : i32
    scf.if %5 {
      %c16_i32 = arith.constant 16 : i32
      %6 = arith.muli %arg1, %c16_i32 : i32
      %7 = tpu.assume_multiple %6, 16 : i32
      %8 = arith.index_cast %7 : i32 to index
      %c0 = arith.constant 0 : index
      %9 = vector.load %arg16[%8, %c0] : memref<16x128xf32, #tpu.memory_space<vmem>>, vector<16x128xf32>
      %c0_2 = arith.constant 0 : index
      %c0_3 = arith.constant 0 : index
      %10 = vector.load %arg11[%c0_2, %c0_3] : memref<8x128xf32, #tpu.memory_space<vmem>>, vector<8x128xf32>
      %cst_4 = arith.constant dense<0.000000e+00> : vector<128xf32>
      %11 = vector.multi_reduction <add>, %10, %cst_4 [0] : vector<8x128xf32> to vector<128xf32>
      %12 = vector.shape_cast %11 : vector<128xf32> to vector<1x128xf32>
      %c0_5 = arith.constant 0 : index
      %c0_6 = arith.constant 0 : index
      %13 = vector.load %arg12[%c0_5, %c0_6] : memref<8x128xf32, #tpu.memory_space<vmem>>, vector<8x128xf32>
      %cst_7 = arith.constant dense<0.000000e+00> : vector<128xf32>
      %14 = vector.multi_reduction <add>, %13, %cst_7 [0] : vector<8x128xf32> to vector<128xf32>
      %15 = vector.shape_cast %14 : vector<128xf32> to vector<1x128xf32>
      %16 = vector.broadcast %cst : f32 to vector<1x128xf32>
      %17 = arith.mulf %12, %16 : vector<1x128xf32>
      %18 = vector.broadcast %cst : f32 to vector<1x128xf32>
      %19 = arith.mulf %15, %18 : vector<1x128xf32>
      %20 = arith.mulf %17, %17 : vector<1x128xf32>
      %21 = arith.subf %19, %20 : vector<1x128xf32>
      %cst_8 = arith.constant 0.000000e+00 : f32
      %22 = vector.broadcast %cst_8 : f32 to vector<1x128xf32>
      %23 = arith.maximumf %21, %22 : vector<1x128xf32>
      %c0_9 = arith.constant 0 : index
      %c0_10 = arith.constant 0 : index
      %24 = vector.load %arg13[%c0_9, %c0_10] : memref<1x128xf32, #tpu.memory_space<vmem>>, vector<1x128xf32>
      %25 = arith.addf %24, %17 : vector<1x128xf32>
      %26 = vector.broadcast %25 : vector<1x128xf32> to vector<16x128xf32>
      %27 = arith.subf %9, %26 : vector<16x128xf32>
      %cst_11 = arith.constant 9.99999974E-6 : f32
      %28 = vector.broadcast %cst_11 : f32 to vector<1x128xf32>
      %29 = arith.addf %23, %28 : vector<1x128xf32>
      %30 = math.rsqrt %29 : vector<1x128xf32>
      %31 = vector.broadcast %30 : vector<1x128xf32> to vector<16x128xf32>
      %32 = arith.mulf %27, %31 : vector<16x128xf32>
      %c0_12 = arith.constant 0 : index
      %c0_13 = arith.constant 0 : index
      %33 = vector.load %arg6[%c0_12, %c0_13] : memref<1x128xf32, #tpu.memory_space<vmem>>, vector<1x128xf32>
      %34 = vector.broadcast %33 : vector<1x128xf32> to vector<16x128xf32>
      %35 = arith.mulf %32, %34 : vector<16x128xf32>
      %c0_14 = arith.constant 0 : index
      %c0_15 = arith.constant 0 : index
      %36 = vector.load %arg7[%c0_14, %c0_15] : memref<1x128xf32, #tpu.memory_space<vmem>>, vector<1x128xf32>
      %37 = vector.broadcast %36 : vector<1x128xf32> to vector<16x128xf32>
      %38 = arith.addf %35, %37 : vector<16x128xf32>
      %cst_16 = arith.constant 0.000000e+00 : f32
      %39 = vector.broadcast %cst_16 : f32 to vector<16x128xf32>
      %40 = arith.maximumf %38, %39 : vector<16x128xf32>
      %41 = arith.truncf %40 : vector<16x128xf32> to vector<16x128xbf16>
      %c0_17 = arith.constant 0 : index
      %c0_18 = arith.constant 0 : index
      %42 = vector.load %arg8[%c0_17, %c0_18] : memref<128x128xbf16, #tpu.memory_space<vmem>>, vector<128x128xbf16>
      %cst_19 = arith.constant dense<0.000000e+00> : vector<16x128xf32>
      %43 = tpu.matmul %41, %42, %cst_19 {dimension_numbers = #tpu.dot_dimension_numbers<[1], [0], [0], [1], [0, 0, 1, 1], [], []>} : vector<16x128xbf16>, vector<128x128xbf16>, vector<16x128xf32> -> vector<16x128xf32>
      %c0_20 = arith.constant 0 : index
      %c0_21 = arith.constant 0 : index
      %44 = vector.load %arg9[%c0_20, %c0_21] : memref<1x128xf32, #tpu.memory_space<vmem>>, vector<1x128xf32>
      %45 = vector.broadcast %44 : vector<1x128xf32> to vector<16x128xf32>
      %46 = arith.addf %43, %45 : vector<16x128xf32>
      %c0_22 = arith.constant 0 : index
      %c0_23 = arith.constant 0 : index
      %47 = vector.load %arg3[%c0_22, %c0_23] : memref<16x128xf32, #tpu.memory_space<vmem>>, vector<16x128xf32>
      %cst_24 = arith.constant 0.000000e+00 : f32
      %48 = vector.broadcast %cst_24 : f32 to vector<16x128xf32>
      %49 = arith.cmpf oge, %47, %48 : vector<16x128xf32>
      %50 = arith.extui %49 : vector<16x128xi1> to vector<16x128xi32>
      %51 = arith.sitofp %50 : vector<16x128xi32> to vector<16x128xf32>
      %cst_25 = arith.constant 0.000000e+00 : f32
      %52 = vector.broadcast %cst_25 : f32 to vector<16x128xf32>
      %53 = arith.maximumf %46, %52 : vector<16x128xf32>
      %54 = arith.mulf %46, %47 : vector<16x128xf32>
      %55 = arith.subf %53, %54 : vector<16x128xf32>
      %56 = math.absf %46 : vector<16x128xf32>
      %cst_26 = arith.constant 0.000000e+00 : f32
      %57 = vector.broadcast %cst_26 : f32 to vector<16x128xf32>
      %58 = arith.subf %57, %56 : vector<16x128xf32>
      %59 = math.exp %58 : vector<16x128xf32>
      %60 = math.log1p %59 : vector<16x128xf32>
      %61 = arith.addf %55, %60 : vector<16x128xf32>
      %c0_27 = arith.constant 0 : index
      %c0_28 = arith.constant 0 : index
      %62 = vector.load %arg14[%c0_27, %c0_28] : memref<8x128xf32, #tpu.memory_space<vmem>>, vector<8x128xf32>
      %63 = arith.mulf %61, %51 : vector<16x128xf32>
      %64 = vector.extract_strided_slice %63 {offsets = [0, 0], sizes = [8, 128], strides = [1, 1]} : vector<16x128xf32> to vector<8x128xf32>
      %65 = vector.extract_strided_slice %63 {offsets = [8, 0], sizes = [8, 128], strides = [1, 1]} : vector<16x128xf32> to vector<8x128xf32>
      %66 = arith.addf %64, %65 : vector<8x128xf32>
      %67 = arith.addf %62, %66 : vector<8x128xf32>
      %c0_29 = arith.constant 0 : index
      %c0_30 = arith.constant 0 : index
      %68 = vector.load %arg14[%c0_29, %c0_30] : memref<8x128xf32, #tpu.memory_space<vmem>>, vector<8x128xf32>
      tpu.vector_store %arg14[%c0_29, %c0_30], %67 {strides = array<i32>} : memref<8x128xf32, #tpu.memory_space<vmem>>, vector<8x128xf32>,
      %c0_31 = arith.constant 0 : index
      %c0_32 = arith.constant 0 : index
      %69 = vector.load %arg15[%c0_31, %c0_32] : memref<8x128xf32, #tpu.memory_space<vmem>>, vector<8x128xf32>
      %70 = vector.extract_strided_slice %51 {offsets = [0, 0], sizes = [8, 128], strides = [1, 1]} : vector<16x128xf32> to vector<8x128xf32>
      %71 = vector.extract_strided_slice %51 {offsets = [8, 0], sizes = [8, 128], strides = [1, 1]} : vector<16x128xf32> to vector<8x128xf32>
      %72 = arith.addf %70, %71 : vector<8x128xf32>
      %73 = arith.addf %69, %72 : vector<8x128xf32>
      %c0_33 = arith.constant 0 : index
      %c0_34 = arith.constant 0 : index
      %74 = vector.load %arg15[%c0_33, %c0_34] : memref<8x128xf32, #tpu.memory_space<vmem>>, vector<8x128xf32>
      tpu.vector_store %arg15[%c0_33, %c0_34], %73 {strides = array<i32>} : memref<8x128xf32, #tpu.memory_space<vmem>>, vector<8x128xf32>,
      %c0_i32_35 = arith.constant 0 : i32
      %75 = arith.cmpi eq, %arg1, %c0_i32_35 : i32
      %76 = arith.extui %75 : i1 to i32
      %c0_i32_36 = arith.constant 0 : i32
      %77 = arith.cmpi ne, %76, %c0_i32_36 : i32
      scf.if %77 {
        %c0_37 = arith.constant 0 : index
        %c0_38 = arith.constant 0 : index
        %78 = vector.load %arg14[%c0_37, %c0_38] : memref<8x128xf32, #tpu.memory_space<vmem>>, vector<8x128xf32>
        %79 = vector.shape_cast %78 : vector<8x128xf32> to vector<1x8x128xf32>
        %cst_39 = arith.constant dense<0.000000e+00> : vector<1xf32>
        %80 = vector.multi_reduction <add>, %79, %cst_39 [1, 2] : vector<1x8x128xf32> to vector<1xf32>
        %81 = vector.shape_cast %80 : vector<1xf32> to vector<1x1x1xf32>
        %82 = vector.extract %81[0, 0, 0] : f32 from vector<1x1x1xf32>
        %c0_40 = arith.constant 0 : index
        %c0_41 = arith.constant 0 : index
        %83 = memref.load %arg10[%c0_40, %c0_41] : memref<1x2xf32, #tpu.memory_space<smem>>
        memref.store %82, %arg10[%c0_40, %c0_41] : memref<1x2xf32, #tpu.memory_space<smem>>
        %c0_42 = arith.constant 0 : index
        %c0_43 = arith.constant 0 : index
        %84 = vector.load %arg15[%c0_42, %c0_43] : memref<8x128xf32, #tpu.memory_space<vmem>>, vector<8x128xf32>
        %85 = vector.shape_cast %84 : vector<8x128xf32> to vector<1x8x128xf32>
        %cst_44 = arith.constant dense<0.000000e+00> : vector<1xf32>
        %86 = vector.multi_reduction <add>, %85, %cst_44 [1, 2] : vector<1x8x128xf32> to vector<1xf32>
        %87 = vector.shape_cast %86 : vector<1xf32> to vector<1x1x1xf32>
        %88 = vector.extract %87[0, 0, 0] : f32 from vector<1x1x1xf32>
        %c0_45 = arith.constant 0 : index
        %c1 = arith.constant 1 : index
        %89 = memref.load %arg10[%c0_45, %c1] : memref<1x2xf32, #tpu.memory_space<smem>>
        memref.store %88, %arg10[%c0_45, %c1] : memref<1x2xf32, #tpu.memory_space<smem>>
      } else {
      }
    } else {
    }
    return
  }
  func.func @transform_0(%arg0: i32, %arg1: i32) -> (i32, i32) {
    %c1_i32 = arith.constant 1 : i32
    %0 = arith.subi %c1_i32, %arg0 : i32
    %1 = arith.muli %arg1, %0 : i32
    %c0_i32 = arith.constant 0 : i32
    %c0_i32_0 = arith.constant 0 : i32
    return %1, %c0_i32 : i32, i32
  }
  func.func @transform_1(%arg0: i32, %arg1: i32) -> (i32, i32) {
    %0 = arith.muli %arg1, %arg0 : i32
    %c0_i32 = arith.constant 0 : i32
    %c0_i32_0 = arith.constant 0 : i32
    return %0, %c0_i32 : i32, i32
  }
  func.func @transform_2(%arg0: i32, %arg1: i32) -> (i32, i32) {
    %c0_i32 = arith.constant 0 : i32
    %c0_i32_0 = arith.constant 0 : i32
    %c0_i32_1 = arith.constant 0 : i32
    return %c0_i32, %c0_i32_0 : i32, i32
  }
  func.func @transform_3(%arg0: i32, %arg1: i32) -> (i32, i32) {
    %c0_i32 = arith.constant 0 : i32
    %c0_i32_0 = arith.constant 0 : i32
    %c0_i32_1 = arith.constant 0 : i32
    return %c0_i32, %c0_i32_0 : i32, i32
  }
  func.func @transform_4(%arg0: i32, %arg1: i32) -> (i32, i32) {
    %c0_i32 = arith.constant 0 : i32
    %c0_i32_0 = arith.constant 0 : i32
    %c0_i32_1 = arith.constant 0 : i32
    return %c0_i32, %c0_i32_0 : i32, i32
  }
  func.func @transform_5(%arg0: i32, %arg1: i32) -> (i32, i32) {
    %c0_i32 = arith.constant 0 : i32
    %c0_i32_0 = arith.constant 0 : i32
    %c0_i32_1 = arith.constant 0 : i32
    return %c0_i32, %c0_i32_0 : i32, i32
  }
  func.func @transform_6(%arg0: i32, %arg1: i32) -> (i32, i32) {
    %c0_i32 = arith.constant 0 : i32
    %c0_i32_0 = arith.constant 0 : i32
    %c0_i32_1 = arith.constant 0 : i32
    return %c0_i32, %c0_i32_0 : i32, i32
  }
  func.func @transform_7(%arg0: i32, %arg1: i32) -> (i32, i32) {
    %c0_i32 = arith.constant 0 : i32
    %c0_i32_0 = arith.constant 0 : i32
    %c0_i32_1 = arith.constant 0 : i32
    return %c0_i32, %c0_i32_0 : i32, i32
  }
  func.func @transform_8(%arg0: i32, %arg1: i32) -> (i32, i32) {
    %c0_i32 = arith.constant 0 : i32
    %c0_i32_0 = arith.constant 0 : i32
    %c0_i32_1 = arith.constant 0 : i32
    return %c0_i32, %c0_i32_0 : i32, i32
  }
}

module attributes {stable_mosaic.version = 11 : i64} {
  func.func @_multitask_kernel(%arg0: i32, %arg1: i32, %arg2: memref<16x128xbf16, #tpu.memory_space<vmem>>, %arg3: memref<16x128xf32, #tpu.memory_space<vmem>>, %arg4: memref<128x128xbf16, #tpu.memory_space<vmem>>, %arg5: memref<1x128xf32, #tpu.memory_space<vmem>>, %arg6: memref<1x128xf32, #tpu.memory_space<vmem>>, %arg7: memref<1x128xf32, #tpu.memory_space<vmem>>, %arg8: memref<128x128xbf16, #tpu.memory_space<vmem>>, %arg9: memref<1x128xf32, #tpu.memory_space<vmem>>, %arg10: memref<1x2xf32, #tpu.memory_space<smem>>, %arg11: memref<8x128xf32, #tpu.memory_space<vmem>>, %arg12: memref<8x128xf32, #tpu.memory_space<vmem>>, %arg13: memref<1x128xf32, #tpu.memory_space<vmem>>, %arg14: memref<8x128xf32, #tpu.memory_space<vmem>>, %arg15: memref<8x128xf32, #tpu.memory_space<vmem>>, %arg16: memref<16x128xf32, #tpu.memory_space<vmem>>) attributes {dimension_semantics = [#tpu.dimension_semantics<arbitrary>, #tpu.dimension_semantics<arbitrary>], iteration_bounds = array<i64: 2, 1>, scalar_prefetch = 0 : i64, scratch_operands = 6 : i64, tpu.core_type = #tpu.core_type<tc>, window_params = [{transform_indices = @transform_0, window_bounds = array<i64: 16, 128>}, {transform_indices = @transform_1, window_bounds = array<i64: 16, 128>}, {pipeline_mode = #tpu.pipeline_mode<synchronous>, transform_indices = @transform_2, window_bounds = array<i64: 128, 128>}, {pipeline_mode = #tpu.pipeline_mode<synchronous>, transform_indices = @transform_3, window_bounds = array<i64: 1, 128>}, {pipeline_mode = #tpu.pipeline_mode<synchronous>, transform_indices = @transform_4, window_bounds = array<i64: 1, 128>}, {pipeline_mode = #tpu.pipeline_mode<synchronous>, transform_indices = @transform_5, window_bounds = array<i64: 1, 128>}, {pipeline_mode = #tpu.pipeline_mode<synchronous>, transform_indices = @transform_6, window_bounds = array<i64: 128, 128>}, {pipeline_mode = #tpu.pipeline_mode<synchronous>, transform_indices = @transform_7, window_bounds = array<i64: 1, 128>}, {transform_indices = @transform_8, window_bounds = array<i64: 1, 2>}]} {
    %c0_i32 = arith.constant 0 : i32
    %0 = arith.cmpi eq, %arg0, %c0_i32 : i32
    %1 = arith.extui %0 : i1 to i32
    %c0_i32_0 = arith.constant 0 : i32
    %2 = arith.cmpi ne, %1, %c0_i32_0 : i32
    scf.if %2 {
      %c0 = arith.constant 0 : index
      %c0_2 = arith.constant 0 : index
      %6 = vector.load %arg2[%c0, %c0_2] : memref<16x128xbf16, #tpu.memory_space<vmem>>, vector<16x128xbf16>
      %c0_3 = arith.constant 0 : index
      %c0_4 = arith.constant 0 : index
      %7 = vector.load %arg4[%c0_3, %c0_4] : memref<128x128xbf16, #tpu.memory_space<vmem>>, vector<128x128xbf16>
      %cst_5 = arith.constant dense<0.000000e+00> : vector<16x128xf32>
      %8 = tpu.matmul %6, %7, %cst_5 {dimension_numbers = #tpu.dot_dimension_numbers<[1], [0], [0], [1], [0, 0, 1, 1], [], []>} : vector<16x128xbf16>, vector<128x128xbf16>, vector<16x128xf32> -> vector<16x128xf32>
      %c0_6 = arith.constant 0 : index
      %c0_7 = arith.constant 0 : index
      %9 = vector.load %arg5[%c0_6, %c0_7] : memref<1x128xf32, #tpu.memory_space<vmem>>, vector<1x128xf32>
      %10 = vector.broadcast %9 : vector<1x128xf32> to vector<16x128xf32>
      %11 = arith.addf %8, %10 : vector<16x128xf32>
      %c0_i32_8 = arith.constant 0 : i32
      %12 = arith.cmpi eq, %arg1, %c0_i32_8 : i32
      %13 = arith.extui %12 : i1 to i32
      %c0_i32_9 = arith.constant 0 : i32
      %14 = arith.cmpi ne, %13, %c0_i32_9 : i32
      scf.if %14 {
        %45 = vector.extract_strided_slice %11 {offsets = [0, 0], sizes = [1, 128], strides = [1, 1]} : vector<16x128xf32> to vector<1x128xf32>
        %c0_22 = arith.constant 0 : index
        %c0_23 = arith.constant 0 : index
        %46 = vector.load %arg13[%c0_22, %c0_23] : memref<1x128xf32, #tpu.memory_space<vmem>>, vector<1x128xf32>
        tpu.vector_store %arg13[%c0_22, %c0_23], %45 {strides = array<i32>} : memref<1x128xf32, #tpu.memory_space<vmem>>, vector<1x128xf32>,
        %cst_24 = arith.constant 0.000000e+00 : f32
        %47 = vector.broadcast %cst_24 : f32 to vector<8x128xf32>
        %c0_25 = arith.constant 0 : index
        %c0_26 = arith.constant 0 : index
        %48 = vector.load %arg11[%c0_25, %c0_26] : memref<8x128xf32, #tpu.memory_space<vmem>>, vector<8x128xf32>
        tpu.vector_store %arg11[%c0_25, %c0_26], %47 {strides = array<i32>} : memref<8x128xf32, #tpu.memory_space<vmem>>, vector<8x128xf32>,
        %cst_27 = arith.constant 0.000000e+00 : f32
        %49 = vector.broadcast %cst_27 : f32 to vector<8x128xf32>
        %c0_28 = arith.constant 0 : index
        %c0_29 = arith.constant 0 : index
        %50 = vector.load %arg12[%c0_28, %c0_29] : memref<8x128xf32, #tpu.memory_space<vmem>>, vector<8x128xf32>
        tpu.vector_store %arg12[%c0_28, %c0_29], %49 {strides = array<i32>} : memref<8x128xf32, #tpu.memory_space<vmem>>, vector<8x128xf32>,
        %cst_30 = arith.constant 0.000000e+00 : f32
        %51 = vector.broadcast %cst_30 : f32 to vector<8x128xf32>
        %c0_31 = arith.constant 0 : index
        %c0_32 = arith.constant 0 : index
        %52 = vector.load %arg14[%c0_31, %c0_32] : memref<8x128xf32, #tpu.memory_space<vmem>>, vector<8x128xf32>
        tpu.vector_store %arg14[%c0_31, %c0_32], %51 {strides = array<i32>} : memref<8x128xf32, #tpu.memory_space<vmem>>, vector<8x128xf32>,
        %cst_33 = arith.constant 0.000000e+00 : f32
        %53 = vector.broadcast %cst_33 : f32 to vector<8x128xf32>
        %c0_34 = arith.constant 0 : index
        %c0_35 = arith.constant 0 : index
        %54 = vector.load %arg15[%c0_34, %c0_35] : memref<8x128xf32, #tpu.memory_space<vmem>>, vector<8x128xf32>
        tpu.vector_store %arg15[%c0_34, %c0_35], %53 {strides = array<i32>} : memref<8x128xf32, #tpu.memory_space<vmem>>, vector<8x128xf32>,
      } else {
      }
      %c16_i32 = arith.constant 16 : i32
      %15 = arith.muli %arg1, %c16_i32 : i32
      %16 = tpu.assume_multiple %15, 16 : i32
      %17 = arith.index_cast %16 : i32 to index
      %c0_10 = arith.constant 0 : index
      %18 = vector.load %arg16[%17, %c0_10] : memref<16x128xf32, #tpu.memory_space<vmem>>, vector<16x128xf32>
      tpu.vector_store %arg16[%17, %c0_10], %11 {strides = array<i32>} : memref<16x128xf32, #tpu.memory_space<vmem>>, vector<16x128xf32>,
      %19 = tpu.iota {dimensions = array<i32: 0>} : vector<16x1xi32>
      %c16_i32_11 = arith.constant 16 : i32
      %20 = arith.muli %arg1, %c16_i32_11 : i32
      %21 = vector.broadcast %20 : i32 to vector<16x1xi32>
      %22 = arith.addi %19, %21 : vector<16x1xi32>
      %c8_i32 = arith.constant 8 : i32
      %23 = vector.broadcast %c8_i32 : i32 to vector<16x1xi32>
      %24 = arith.cmpi slt, %22, %23 : vector<16x1xi32>
      %25 = arith.extui %24 : vector<16x1xi1> to vector<16x1xi32>
      %26 = arith.sitofp %25 : vector<16x1xi32> to vector<16x1xf32>
      %c0_12 = arith.constant 0 : index
      %c0_13 = arith.constant 0 : index
      %27 = vector.load %arg13[%c0_12, %c0_13] : memref<1x128xf32, #tpu.memory_space<vmem>>, vector<1x128xf32>
      %28 = vector.broadcast %27 : vector<1x128xf32> to vector<16x128xf32>
      %29 = arith.subf %11, %28 : vector<16x128xf32>
      %30 = vector.broadcast %26 : vector<16x1xf32> to vector<16x128xf32>
      %31 = arith.mulf %29, %30 : vector<16x128xf32>
      %c0_14 = arith.constant 0 : index
      %c0_15 = arith.constant 0 : index
      %32 = vector.load %arg11[%c0_14, %c0_15] : memref<8x128xf32, #tpu.memory_space<vmem>>, vector<8x128xf32>
      %33 = vector.extract_strided_slice %31 {offsets = [0, 0], sizes = [8, 128], strides = [1, 1]} : vector<16x128xf32> to vector<8x128xf32>
      %34 = vector.extract_strided_slice %31 {offsets = [8, 0], sizes = [8, 128], strides = [1, 1]} : vector<16x128xf32> to vector<8x128xf32>
      %35 = arith.addf %33, %34 : vector<8x128xf32>
      %36 = arith.addf %32, %35 : vector<8x128xf32>
      %c0_16 = arith.constant 0 : index
      %c0_17 = arith.constant 0 : index
      %37 = vector.load %arg11[%c0_16, %c0_17] : memref<8x128xf32, #tpu.memory_space<vmem>>, vector<8x128xf32>
      tpu.vector_store %arg11[%c0_16, %c0_17], %36 {strides = array<i32>} : memref<8x128xf32, #tpu.memory_space<vmem>>, vector<8x128xf32>,
      %c0_18 = arith.constant 0 : index
      %c0_19 = arith.constant 0 : index
      %38 = vector.load %arg12[%c0_18, %c0_19] : memref<8x128xf32, #tpu.memory_space<vmem>>, vector<8x128xf32>
      %39 = arith.mulf %31, %29 : vector<16x128xf32>
      %40 = vector.extract_strided_slice %39 {offsets = [0, 0], sizes = [8, 128], strides = [1, 1]} : vector<16x128xf32> to vector<8x128xf32>
      %41 = vector.extract_strided_slice %39 {offsets = [8, 0], sizes = [8, 128], strides = [1, 1]} : vector<16x128xf32> to vector<8x128xf32>
      %42 = arith.addf %40, %41 : vector<8x128xf32>
      %43 = arith.addf %38, %42 : vector<8x128xf32>
      %c0_20 = arith.constant 0 : index
      %c0_21 = arith.constant 0 : index
      %44 = vector.load %arg12[%c0_20, %c0_21] : memref<8x128xf32, #tpu.memory_space<vmem>>, vector<8x128xf32>
      tpu.vector_store %arg12[%c0_20, %c0_21], %43 {strides = array<i32>} : memref<8x128xf32, #tpu.memory_space<vmem>>, vector<8x128xf32>,
    } else {
    }
    %c1_i32 = arith.constant 1 : i32
    %3 = arith.cmpi eq, %arg0, %c1_i32 : i32
    %4 = arith.extui %3 : i1 to i32
    %cst = arith.constant 1.250000e-01 : f32
    %c0_i32_1 = arith.constant 0 : i32
    %5 = arith.cmpi ne, %4, %c0_i32_1 : i32
    scf.if %5 {
      %c16_i32 = arith.constant 16 : i32
      %6 = arith.muli %arg1, %c16_i32 : i32
      %7 = tpu.assume_multiple %6, 16 : i32
      %8 = arith.index_cast %7 : i32 to index
      %c0 = arith.constant 0 : index
      %9 = vector.load %arg16[%8, %c0] : memref<16x128xf32, #tpu.memory_space<vmem>>, vector<16x128xf32>
      %c0_2 = arith.constant 0 : index
      %c0_3 = arith.constant 0 : index
      %10 = vector.load %arg11[%c0_2, %c0_3] : memref<8x128xf32, #tpu.memory_space<vmem>>, vector<8x128xf32>
      %cst_4 = arith.constant dense<0.000000e+00> : vector<128xf32>
      %11 = vector.multi_reduction <add>, %10, %cst_4 [0] : vector<8x128xf32> to vector<128xf32>
      %12 = vector.shape_cast %11 : vector<128xf32> to vector<1x128xf32>
      %c0_5 = arith.constant 0 : index
      %c0_6 = arith.constant 0 : index
      %13 = vector.load %arg12[%c0_5, %c0_6] : memref<8x128xf32, #tpu.memory_space<vmem>>, vector<8x128xf32>
      %cst_7 = arith.constant dense<0.000000e+00> : vector<128xf32>
      %14 = vector.multi_reduction <add>, %13, %cst_7 [0] : vector<8x128xf32> to vector<128xf32>
      %15 = vector.shape_cast %14 : vector<128xf32> to vector<1x128xf32>
      %16 = vector.broadcast %cst : f32 to vector<1x128xf32>
      %17 = arith.mulf %12, %16 : vector<1x128xf32>
      %18 = vector.broadcast %cst : f32 to vector<1x128xf32>
      %19 = arith.mulf %15, %18 : vector<1x128xf32>
      %20 = arith.mulf %17, %17 : vector<1x128xf32>
      %21 = arith.subf %19, %20 : vector<1x128xf32>
      %cst_8 = arith.constant 0.000000e+00 : f32
      %22 = vector.broadcast %cst_8 : f32 to vector<1x128xf32>
      %23 = arith.maximumf %21, %22 : vector<1x128xf32>
      %c0_9 = arith.constant 0 : index
      %c0_10 = arith.constant 0 : index
      %24 = vector.load %arg13[%c0_9, %c0_10] : memref<1x128xf32, #tpu.memory_space<vmem>>, vector<1x128xf32>
      %25 = arith.addf %24, %17 : vector<1x128xf32>
      %26 = vector.broadcast %25 : vector<1x128xf32> to vector<16x128xf32>
      %27 = arith.subf %9, %26 : vector<16x128xf32>
      %cst_11 = arith.constant 9.99999974E-6 : f32
      %28 = vector.broadcast %cst_11 : f32 to vector<1x128xf32>
      %29 = arith.addf %23, %28 : vector<1x128xf32>
      %30 = math.rsqrt %29 : vector<1x128xf32>
      %31 = vector.broadcast %30 : vector<1x128xf32> to vector<16x128xf32>
      %32 = arith.mulf %27, %31 : vector<16x128xf32>
      %c0_12 = arith.constant 0 : index
      %c0_13 = arith.constant 0 : index
      %33 = vector.load %arg6[%c0_12, %c0_13] : memref<1x128xf32, #tpu.memory_space<vmem>>, vector<1x128xf32>
      %34 = vector.broadcast %33 : vector<1x128xf32> to vector<16x128xf32>
      %35 = arith.mulf %32, %34 : vector<16x128xf32>
      %c0_14 = arith.constant 0 : index
      %c0_15 = arith.constant 0 : index
      %36 = vector.load %arg7[%c0_14, %c0_15] : memref<1x128xf32, #tpu.memory_space<vmem>>, vector<1x128xf32>
      %37 = vector.broadcast %36 : vector<1x128xf32> to vector<16x128xf32>
      %38 = arith.addf %35, %37 : vector<16x128xf32>
      %cst_16 = arith.constant 0.000000e+00 : f32
      %39 = vector.broadcast %cst_16 : f32 to vector<16x128xf32>
      %40 = arith.maximumf %38, %39 : vector<16x128xf32>
      %41 = arith.truncf %40 : vector<16x128xf32> to vector<16x128xbf16>
      %c0_17 = arith.constant 0 : index
      %c0_18 = arith.constant 0 : index
      %42 = vector.load %arg8[%c0_17, %c0_18] : memref<128x128xbf16, #tpu.memory_space<vmem>>, vector<128x128xbf16>
      %cst_19 = arith.constant dense<0.000000e+00> : vector<16x128xf32>
      %43 = tpu.matmul %41, %42, %cst_19 {dimension_numbers = #tpu.dot_dimension_numbers<[1], [0], [0], [1], [0, 0, 1, 1], [], []>} : vector<16x128xbf16>, vector<128x128xbf16>, vector<16x128xf32> -> vector<16x128xf32>
      %c0_20 = arith.constant 0 : index
      %c0_21 = arith.constant 0 : index
      %44 = vector.load %arg9[%c0_20, %c0_21] : memref<1x128xf32, #tpu.memory_space<vmem>>, vector<1x128xf32>
      %45 = vector.broadcast %44 : vector<1x128xf32> to vector<16x128xf32>
      %46 = arith.addf %43, %45 : vector<16x128xf32>
      %c0_22 = arith.constant 0 : index
      %c0_23 = arith.constant 0 : index
      %47 = vector.load %arg3[%c0_22, %c0_23] : memref<16x128xf32, #tpu.memory_space<vmem>>, vector<16x128xf32>
      %cst_24 = arith.constant 0.000000e+00 : f32
      %48 = vector.broadcast %cst_24 : f32 to vector<16x128xf32>
      %49 = arith.cmpf oge, %47, %48 : vector<16x128xf32>
      %50 = arith.extui %49 : vector<16x128xi1> to vector<16x128xi32>
      %51 = arith.sitofp %50 : vector<16x128xi32> to vector<16x128xf32>
      %cst_25 = arith.constant 0.000000e+00 : f32
      %52 = vector.broadcast %cst_25 : f32 to vector<16x128xf32>
      %53 = arith.maximumf %46, %52 : vector<16x128xf32>
      %54 = arith.mulf %46, %47 : vector<16x128xf32>
      %55 = arith.subf %53, %54 : vector<16x128xf32>
      %56 = math.absf %46 : vector<16x128xf32>
      %cst_26 = arith.constant 0.000000e+00 : f32
      %57 = vector.broadcast %cst_26 : f32 to vector<16x128xf32>
      %58 = arith.subf %57, %56 : vector<16x128xf32>
      %59 = math.exp %58 : vector<16x128xf32>
      %60 = math.log1p %59 : vector<16x128xf32>
      %61 = arith.addf %55, %60 : vector<16x128xf32>
      %c0_27 = arith.constant 0 : index
      %c0_28 = arith.constant 0 : index
      %62 = vector.load %arg14[%c0_27, %c0_28] : memref<8x128xf32, #tpu.memory_space<vmem>>, vector<8x128xf32>
      %63 = arith.mulf %61, %51 : vector<16x128xf32>
      %64 = vector.extract_strided_slice %63 {offsets = [0, 0], sizes = [8, 128], strides = [1, 1]} : vector<16x128xf32> to vector<8x128xf32>
      %65 = vector.extract_strided_slice %63 {offsets = [8, 0], sizes = [8, 128], strides = [1, 1]} : vector<16x128xf32> to vector<8x128xf32>
      %66 = arith.addf %64, %65 : vector<8x128xf32>
      %67 = arith.addf %62, %66 : vector<8x128xf32>
      %c0_29 = arith.constant 0 : index
      %c0_30 = arith.constant 0 : index
      %68 = vector.load %arg14[%c0_29, %c0_30] : memref<8x128xf32, #tpu.memory_space<vmem>>, vector<8x128xf32>
      tpu.vector_store %arg14[%c0_29, %c0_30], %67 {strides = array<i32>} : memref<8x128xf32, #tpu.memory_space<vmem>>, vector<8x128xf32>,
      %c0_31 = arith.constant 0 : index
      %c0_32 = arith.constant 0 : index
      %69 = vector.load %arg15[%c0_31, %c0_32] : memref<8x128xf32, #tpu.memory_space<vmem>>, vector<8x128xf32>
      %70 = vector.extract_strided_slice %51 {offsets = [0, 0], sizes = [8, 128], strides = [1, 1]} : vector<16x128xf32> to vector<8x128xf32>
      %71 = vector.extract_strided_slice %51 {offsets = [8, 0], sizes = [8, 128], strides = [1, 1]} : vector<16x128xf32> to vector<8x128xf32>
      %72 = arith.addf %70, %71 : vector<8x128xf32>
      %73 = arith.addf %69, %72 : vector<8x128xf32>
      %c0_33 = arith.constant 0 : index
      %c0_34 = arith.constant 0 : index
      %74 = vector.load %arg15[%c0_33, %c0_34] : memref<8x128xf32, #tpu.memory_space<vmem>>, vector<8x128xf32>
      tpu.vector_store %arg15[%c0_33, %c0_34], %73 {strides = array<i32>} : memref<8x128xf32, #tpu.memory_space<vmem>>, vector<8x128xf32>,
      %c0_i32_35 = arith.constant 0 : i32
      %75 = arith.cmpi eq, %arg1, %c0_i32_35 : i32
      %76 = arith.extui %75 : i1 to i32
      %c0_i32_36 = arith.constant 0 : i32
      %77 = arith.cmpi ne, %76, %c0_i32_36 : i32
      scf.if %77 {
        %c0_37 = arith.constant 0 : index
        %c0_38 = arith.constant 0 : index
        %78 = vector.load %arg14[%c0_37, %c0_38] : memref<8x128xf32, #tpu.memory_space<vmem>>, vector<8x128xf32>
        %79 = vector.shape_cast %78 : vector<8x128xf32> to vector<1x8x128xf32>
        %cst_39 = arith.constant dense<0.000000e+00> : vector<1xf32>
        %80 = vector.multi_reduction <add>, %79, %cst_39 [1, 2] : vector<1x8x128xf32> to vector<1xf32>
        %81 = vector.shape_cast %80 : vector<1xf32> to vector<1x1x1xf32>
        %82 = vector.extract %81[0, 0, 0] : f32 from vector<1x1x1xf32>
        %c0_40 = arith.constant 0 : index
        %c0_41 = arith.constant 0 : index
        %83 = memref.load %arg10[%c0_40, %c0_41] : memref<1x2xf32, #tpu.memory_space<smem>>
        memref.store %82, %arg10[%c0_40, %c0_41] : memref<1x2xf32, #tpu.memory_space<smem>>
        %c0_42 = arith.constant 0 : index
        %c0_43 = arith.constant 0 : index
        %84 = vector.load %arg15[%c0_42, %c0_43] : memref<8x128xf32, #tpu.memory_space<vmem>>, vector<8x128xf32>
        %85 = vector.shape_cast %84 : vector<8x128xf32> to vector<1x8x128xf32>
        %cst_44 = arith.constant dense<0.000000e+00> : vector<1xf32>
        %86 = vector.multi_reduction <add>, %85, %cst_44 [1, 2] : vector<1x8x128xf32> to vector<1xf32>
        %87 = vector.shape_cast %86 : vector<1xf32> to vector<1x1x1xf32>
        %88 = vector.extract %87[0, 0, 0] : f32 from vector<1x1x1xf32>
        %c0_45 = arith.constant 0 : index
        %c1 = arith.constant 1 : index
        %89 = memref.load %arg10[%c0_45, %c1] : memref<1x2xf32, #tpu.memory_space<smem>>
        memref.store %88, %arg10[%c0_45, %c1] : memref<1x2xf32, #tpu.memory_space<smem>>
      } else {
      }
    } else {
    }
    return
  }
  func.func @transform_0(%arg0: i32, %arg1: i32) -> (i32, i32) {
    %c1_i32 = arith.constant 1 : i32
    %0 = arith.subi %c1_i32, %arg0 : i32
    %1 = arith.muli %arg1, %0 : i32
    %c0_i32 = arith.constant 0 : i32
    %c0_i32_0 = arith.constant 0 : i32
    return %1, %c0_i32 : i32, i32
  }
  func.func @transform_1(%arg0: i32, %arg1: i32) -> (i32, i32) {
    %0 = arith.muli %arg1, %arg0 : i32
    %c0_i32 = arith.constant 0 : i32
    %c0_i32_0 = arith.constant 0 : i32
    return %0, %c0_i32 : i32, i32
  }
  func.func @transform_2(%arg0: i32, %arg1: i32) -> (i32, i32) {
    %c0_i32 = arith.constant 0 : i32
    %c0_i32_0 = arith.constant 0 : i32
    %c0_i32_1 = arith.constant 0 : i32
    return %c0_i32, %c0_i32_0 : i32, i32
  }
  func.func @transform_3(%arg0: i32, %arg1: i32) -> (i32, i32) {
    %c0_i32 = arith.constant 0 : i32
    %c0_i32_0 = arith.constant 0 : i32
    %c0_i32_1 = arith.constant 0 : i32
    return %c0_i32, %c0_i32_0 : i32, i32
  }
  func.func @transform_4(%arg0: i32, %arg1: i32) -> (i32, i32) {
    %c0_i32 = arith.constant 0 : i32
    %c0_i32_0 = arith.constant 0 : i32
    %c0_i32_1 = arith.constant 0 : i32
    return %c0_i32, %c0_i32_0 : i32, i32
  }
  func.func @transform_5(%arg0: i32, %arg1: i32) -> (i32, i32) {
    %c0_i32 = arith.constant 0 : i32
    %c0_i32_0 = arith.constant 0 : i32
    %c0_i32_1 = arith.constant 0 : i32
    return %c0_i32, %c0_i32_0 : i32, i32
  }
  func.func @transform_6(%arg0: i32, %arg1: i32) -> (i32, i32) {
    %c0_i32 = arith.constant 0 : i32
    %c0_i32_0 = arith.constant 0 : i32
    %c0_i32_1 = arith.constant 0 : i32
    return %c0_i32, %c0_i32_0 : i32, i32
  }
  func.func @transform_7(%arg0: i32, %arg1: i32) -> (i32, i32) {
    %c0_i32 = arith.constant 0 : i32
    %c0_i32_0 = arith.constant 0 : i32
    %c0_i32_1 = arith.constant 0 : i32
    return %c0_i32, %c0_i32_0 : i32, i32
  }
  func.func @transform_8(%arg0: i32, %arg1: i32) -> (i32, i32) {
    %c0_i32 = arith.constant 0 : i32
    %c0_i32_0 = arith.constant 0 : i32
    %c0_i32_1 = arith.constant 0 : i32
    return %c0_i32, %c0_i32_0 : i32, i32
  }
}

</mosaic_0001>

<bundles_post_ra>
// kernel: tpu_custom_call.1
= control target key start
LH: loop header
LB: loop body
LE: loop exit
PB: predicated region body
PF: predicated region fallthrough
CT: control target
= control target key end

     0   :  { %13 = vsyncpa [#allocation9], 0  ;;  %s1586_s0 = inlined_call_operand.hbm [shape: bf16[16,128], index: 0, kind: input, shape index: {}]   ;;  %s1587_s1 = inlined_call_operand.hbm [shape: f32[16,128], index: 1, kind: input, shape index: {}]   ;;  %s1588_s2 = inlined_call_operand.hbm [shape: bf16[128,128], index: 2, kind: input, shape index: {}]   ;;  %s1589_s3 = inlined_call_operand.vmem [shape: f32[1,128], index: 3, kind: input, shape index: {}]   ;;  %s1590_s4 = inlined_call_operand.vmem [shape: f32[1,128], index: 4, kind: input, shape index: {}]   ;;  %s1591_s5 = inlined_call_operand.vmem [shape: f32[1,128], index: 5, kind: input, shape index: {}]   ;;  %s1592_s6 = inlined_call_operand.hbm [shape: bf16[128,128], index: 6, kind: input, shape index: {}]   ;;  %s1593_s7 = inlined_call_operand.vmem [shape: f32[1,128], index: 7, kind: input, shape index: {}]   ;;  %s1594_s8 = inlined_call_operand.hbm [shape: f32[1,2], index: 8, kind: output, shape index: {}]  }
   0x1   :  { %15 = vsyncpa [#allocation9 + $0x1], 0 }
   0x2   :  { %16 = vsyncpa [#allocation12], 0 }
   0x3   :  { %18 = vsyncpa [#allocation12 + $0x1], 0 }
   0x4   :  { %19 = vsyncpa [#allocation15], 0 }
   0x5   :  { %20 = vsyncpa [#allocation10], 0  ;;  %s1382_s27 = smov 0   ;;  %s1384_s28 = smov 0  }
   0x6   :  { %s1386_s29 = smov 0  }
   0x7 LB: > { %s1398_s30 = sadd.s32 4294967295, %s1322_s29   ;;  %s38_s9 = sadd.s32 1, %s1318_s28  ;;  %s1322_s29 = sphi %s1386_s29, %s26_s29   ;;  %s1318_s28 = sphi %s1384_s28, %s1611_s28   ;;  %s1314_s27 = sphi %s1382_s27, %s1610_s27  }
   0x8   : > { %p40_p0 = scmp.ge.s32.totalorder %s38_s9, 2  ;;  %p944_p1 = scmp.ge.s32.totalorder %s1322_s29, 1 }
   0x9   : > { %p248_p2 = scmp.lt.s32.totalorder %s1322_s29, 3  ;;  %p1595_p4 = scmp.eq.s32.totalorder %s1398_s30, 0 }
   0xa   : > { %s1613_s9 = smov (%p40_p0, %s38_s9), 0  ;;  %s1324_s11 = smov [#allocation13]  }
   0xb   : > { %p1405_p3 = pnand %p944_p1, %p248_p2  ;;  %s260_s12 = sshll.u32 %s1324_s11, 4  ;;  %s261_s12 = int_to_ptr.vmem [resolvable:$true] %s260_s12 }
   0xc   : > { %s1325_s14 = smov [#allocation14]   ;;  %s1156_s18 = scalar_lea.hbm %s1588_s2, 1024 }
   0xd   : > { %s1597_s10 = scalar_select %p1405_p3, 1, 0 }
   0xe   : > { %p1067_p5 = pneg %p1405_p3  ;;  %s282_s15 = sshll.u32 %s1325_s14, 4  ;;  %s283_s15 = int_to_ptr.vmem [resolvable:$true] %s282_s15 }
   0xf   : > { %p1157_p7 = scmp.ne.s32.totalorder %s1588_s2, %s1156_s18  ;;  %p1163_p11 = scmp.lt.u32.totalorder %s1156_s18, %s1588_s2 }
  0x10   : > { %p1414_p6 = pnand %p1595_p4, %p1067_p5 }
  0x12   : > { %p1158_p8 = pneg %p1414_p6 }
  0x14   : > { %p1159_p9 = pnand %p1158_p8, %p1157_p7 }
  0x16   : > { %p1160_p10 = pneg %p1159_p9 }
  0x18   : > { %p1165_p12 = pnand %p1163_p11, %p1160_p10 }
  0x1a   : > { %1168 = shalt.err (!%p1165_p12)
}
  0x1b   : > { %s1169_s23 = scalar_lea.vmem %s261_s12, 1024  ;;  %p1177_p2 = scmp.lt.s32.totalorder %s261_s12, %s261_s12 }
  0x1c   : > { %p1170_p13 = scmp.ne.s32.totalorder %s261_s12, %s1169_s23  ;;  %p1178_p5 = scmp.lt.s32.totalorder %s1169_s23, %s1169_s23 }
  0x1e   : > { %p1172_p0 = pnand %p1170_p13, %p1158_p8  ;;  %p1179_p4 = por %p1178_p5, %p1177_p2 }
  0x20   : > { %p1173_p1 = pneg %p1172_p0 }
  0x22   : > { %p1180_p3 = pnand %p1179_p4, %p1173_p1 }
  0x24   : > { %1183 = shalt.err (!%p1180_p3)
}
  0x25   : > { %s1326_s24 = smov 64   ;;  %s1327_s25 = smov 4  }
  0x26   : > { %1070 = dma.hbm_to_vmem [thread:$0]  (!%p1414_p6), %s1588_s2, 1024, %s261_s12, [#allocation12], %s1326_s24, %s1326_s24, %s1327_s25  }
  0x27   : > { %s1184_s17 = scalar_lea.hbm %s1592_s6, 1024 }
  0x28   : > { %p1185_p3 = scmp.ne.s32.totalorder %s1592_s6, %s1184_s17  ;;  %p1191_p10 = scmp.lt.u32.totalorder %s1184_s17, %s1592_s6 }
  0x2a   : > { %p1187_p4 = pnand %p1185_p3, %p1158_p8 }
  0x2c   : > { %p1188_p9 = pneg %p1187_p4 }
  0x2e   : > { %p1193_p11 = pnand %p1191_p10, %p1188_p9 }
  0x30   : > { %1196 = shalt.err (!%p1193_p11)
}
  0x31   : > { %s1197_s12 = scalar_lea.vmem %s283_s15, 1024  ;;  %p1205_p1 = scmp.lt.s32.totalorder %s283_s15, %s283_s15 }
  0x32   : > { %p1198_p12 = scmp.ne.s32.totalorder %s283_s15, %s1197_s12  ;;  %p1206_p2 = scmp.lt.s32.totalorder %s1197_s12, %s1197_s12 }
  0x34   : > { %p1200_p13 = pnand %p1198_p12, %p1158_p8  ;;  %p1207_p5 = por %p1206_p2, %p1205_p1 }
  0x36   : > { %p1201_p0 = pneg %p1200_p13 }
  0x38   : > { %p1208_p7 = pnand %p1207_p5, %p1201_p0 }
  0x3a   : > { %1211 = shalt.err (!%p1208_p7)
}
  0x3b   : > { %1073 = dma.hbm_to_vmem [thread:$0]  (!%p1414_p6), %s1592_s6, 1024, %s283_s15, [#allocation15], %s1326_s24, %s1326_s24, %s1327_s25  }
  0x3c   : > { %p1084_p3 = scmp.eq.s32.totalorder %s1322_s29, 0  ;;  %s1328_s26 = smov [#allocation8]  }
  0x3d   : > { %s312_s11 = sshll.u32 %s1328_s26, 4  ;;  %s322_s14 = sand.u32 1, %s1322_s29   ;;  %s313_s11 = int_to_ptr.vmem [resolvable:$true] %s312_s11 }
  0x3e   : > { %p1599_p8 = scmp.lt.s32.totalorder %s1322_s29, 2  ;;  %s1329_s13 = smov [#allocation11]  }
  0x3f   : > { %s334_s17 = sshll.u32 %s1329_s13, 4  ;;  %s1212_s20 = scalar_lea.hbm %s1586_s0, 128  ;;  %s335_s17 = int_to_ptr.vmem [resolvable:$true] %s334_s17 }
  0x40   : > { %p1471_p4 = pnand %p1084_p3, %p1599_p8  ;;  %p1213_p6 = scmp.ne.s32.totalorder %s1586_s0, %s1212_s20 }
  0x41   : > { %p1219_p11 = scmp.lt.u32.totalorder %s1212_s20, %s1586_s0 }
  0x42   : > { %p1214_p7 = pneg %p1471_p4 }
  0x44   : > { %p1215_p9 = pnand %p1214_p7, %p1213_p6 }
  0x46   : > { %p1216_p10 = pneg %p1215_p9 }
  0x48   : > { %p1221_p12 = pnand %p1219_p11, %p1216_p10 }
  0x4a   : > { %1224 = shalt.err (!%p1221_p12)
}
  0x4b   : > { %s1225_s23 = scalar_lea.vmem %s313_s11, 128  ;;  %s1232_s26 = scalar_lea.vmem %s313_s11, 256 }
  0x4c   : > { %p1226_p13 = scmp.ne.s32.totalorder %s313_s11, %s1225_s23  ;;  %p1233_p2 = scmp.lt.s32.totalorder %s313_s11, %s313_s11 }
  0x4d   : > { %p1234_p5 = scmp.lt.s32.totalorder %s1232_s26, %s1225_s23 }
  0x4e   : > { %p1228_p0 = pnand %p1226_p13, %p1214_p7 }
  0x4f   : > { %p1235_p3 = por %p1234_p5, %p1233_p2 }
  0x50   : > { %p1229_p1 = pneg %p1228_p0 }
  0x52   : > { %p1236_p8 = pnand %p1235_p3, %p1229_p1 }
  0x54   : > { %1239 = shalt.err (!%p1236_p8)
}
  0x55   : > { %1077 = dma.hbm_to_vmem [thread:$0]  (!%p1471_p4), %s1586_s0, 128, %s313_s11, [#allocation9], %s1326_s24, %s1326_s24, %s1327_s25  }
  0x56   : > { %s323_s19 = scalar_lea.sflag [#allocation12], %s322_s14  ;;  %s1240_s15 = scalar_lea.hbm %s1587_s1, 256 }
  0x57   : > { %p1241_p6 = scmp.ne.s32.totalorder %s1587_s1, %s1240_s15  ;;  %p1247_p11 = scmp.lt.u32.totalorder %s1240_s15, %s1587_s1 }
  0x59   : > { %p1243_p9 = pnand %p1241_p6, %p1214_p7 }
  0x5b   : > { %p1244_p10 = pneg %p1243_p9 }
  0x5d   : > { %p1249_p12 = pnand %p1247_p11, %p1244_p10 }
  0x5f   : > { %1252 = shalt.err (!%p1249_p12)
}
  0x60   : > { %s1253_s24 = scalar_lea.vmem %s335_s17, 256  ;;  %s1260_s25 = scalar_lea.vmem %s335_s17, 512 }
  0x61   : > { %p1254_p13 = scmp.ne.s32.totalorder %s335_s17, %s1253_s24  ;;  %p1261_p2 = scmp.lt.s32.totalorder %s335_s17, %s335_s17 }
  0x62   : > { %p1262_p5 = scmp.lt.s32.totalorder %s1260_s25, %s1253_s24 }
  0x63   : > { %p1256_p0 = pnand %p1254_p13, %p1214_p7 }
  0x64   : > { %p1263_p3 = por %p1262_p5, %p1261_p2 }
  0x65   : > { %p1257_p1 = pneg %p1256_p0 }
  0x67   : > { %p1264_p8 = pnand %p1263_p3, %p1257_p1 }
  0x69   : > { %1267 = shalt.err (!%p1264_p8)
}
  0x6a   : > { %s1330_s11 = smov 128   ;;  %s1331_s14 = smov 8  }
  0x6b   : > { %1080 = dma.hbm_to_vmem [thread:$0]  (!%p1471_p4), %s1587_s1, 256, %s335_s17, %s323_s19, %s1330_s11, %s1330_s11, %s1331_s14  }
  0x6c   : > { %p1601_p6 = scmp.ne.s32.totalorder %s1597_s10, 0 }
  0x6d   : > { %p1602_p7 = scmp.eq.s32.totalorder (!%p1601_p6), %s1398_s30, 0 }
  0x6e   : > { %346 = sbr.rel (%p1601_p6) target bundleno = 921 (0x399), region = 52 }
  0x75   : > { %1293 = dma.done.wait (%p1602_p7), [#allocation9], 128   ;;  %p1603_p9 = pmov %p1602_p7 }
  0x76   : > { %s357_s20 = sand.u32 1, %s1398_s30   ;;  %p1604_p10 = pmov %p1602_p7 }
  0x77   : > { %1295 = vsyncadd (%p1603_p9), [#allocation9], 4294967168  ;;  %s358_s21 = scalar_lea.sflag [#allocation12], %s357_s20 }
  0x78   : > { %1297 = dma.done.wait (%p1604_p10), %s358_s21, 256   ;;  %p1605_p11 = pmov %p1602_p7 }
  0x79   : > { %p1606_p4 = pmov %p1602_p7 }
  0x7a   : > { %1299 = vsyncadd (%p1605_p11), %s358_s21, 4294967040 }
  0x7b   : > { %1301 = dma.done.wait (%p1606_p4), [#allocation12], 1024   ;;  %p1607_p12 = pmov %p1606_p4 }
  0x7c   : > { %p1608_p13 = pmov %p1606_p4 }
  0x7d   : > { %1303 = vsyncadd (%p1607_p12), [#allocation12], 4294966272 }
  0x7e   : > { %1305 = dma.done.wait (%p1608_p13), [#allocation15], 1024   ;;  %p1609_p0 = pmov %p1606_p4 }
  0x7f   : > { %p955_p1 = scmp.ne.s32.totalorder %s1314_s27, 0 }
  0x80   : > { %1307 = vsyncadd (%p1609_p0), [#allocation15], 4294966272  ;;  %v1129_v0 = vld [vmem:[#allocation13] sm:$0xff] (!%p955_p1)   ;;  %v1332_v1 = vmov (!%p955_p1), 0.0   ;;  %v1130_v2 = vld [vmem:[#allocation13 + $0x8] sm:$0xff] (!%p955_p1)   ;;  %vm1333_vm0 = vmmov (!%p955_p1), 0  }
  0x81   : > { %411 = sbr.rel (%p955_p1) target bundleno = 392 (0x188), region = 72  ;;  %1003 = vmatprep.subr.bf16.mxu0 (!%p955_p1), %v1332_v1  ;;  %539 = vst [vmem:[#allocation5] sm:$0xff] (!%p955_p1), %v1332_v1  ;;  %540 = vst [vmem:[#allocation6] sm:$0xff] (!%p955_p1), %v1332_v1  ;;  %1019 = vmatprep.mubr.msk.bf16.mxu0 (!%p955_p1), %vm1333_vm0, %v1332_v1  ;;  %v1131_v3 = vld [vmem:[#allocation13 + $0x10] sm:$0xff] (!%p955_p1)   ;;  %v1132_v4 = vld [vmem:[#allocation13 + $0x18] sm:$0xff] (!%p955_p1)  }
  0x82   : > { %1004 = vmatpush3.bf16.msra.mxu0 (!%p955_p1), %v1129_v0  ;;  %v1133_v5 = vld [vmem:[#allocation13 + $0x20] sm:$0xff] (!%p955_p1)   ;;  %v1134_v6 = vld [vmem:[#allocation13 + $0x28] sm:$0xff] (!%p955_p1)   ;;  %v1135_v7 = vld [vmem:[#allocation13 + $0x30] sm:$0xff] (!%p955_p1)  }
  0x83   : > { %1005 = vmatprep.subr.bf16.mxu0 (!%p955_p1), %v1332_v1  ;;  %v1136_v8 = vld [vmem:[#allocation13 + $0x38] sm:$0xff] (!%p955_p1)   ;;  %v1137_v9 = vld [vmem:[#allocation8] sm:$0xff] (!%p955_p1)  }
  0x84   : > { %v956_v10 = vld [vmem:[%s1589_s3] ss:$0 sm:$0xff] (!%p955_p1) }
  0x86   : > { %1006 = vmatpush3.bf16.msra.mxu0 (!%p955_p1), %v1130_v2 }
  0x87   : > { %1007 = vmatprep.subr.bf16.mxu0 (!%p955_p1), %v1332_v1 }
  0x8a   : > { %1008 = vmatpush3.bf16.msra.mxu0 %v1131_v3 }
  0x8b   : > { %1009 = vmatprep.subr.bf16.mxu0 %v1332_v1 }
  0x8e   : > { %1010 = vmatpush3.bf16.msra.mxu0 %v1132_v4 }
  0x8f   : > { %1011 = vmatprep.subr.bf16.mxu0 %v1332_v1 }
  0x92   : > { %1012 = vmatpush3.bf16.msra.mxu0 %v1133_v5 }
  0x93   : > { %1013 = vmatprep.subr.bf16.mxu0 %v1332_v1 }
  0x96   : > { %1014 = vmatpush3.bf16.msra.mxu0 %v1134_v6 }
  0x97   : > { %1015 = vmatprep.subr.bf16.mxu0 %v1332_v1 }
  0x9a   : > { %1016 = vmatpush3.bf16.msra.mxu0 %v1135_v7 }
  0x9b   : > { %1017 = vmatprep.subr.bf16.mxu0 %v1332_v1 }
  0x9e   : > { %1018 = vmatpush3.bf16.msra.mxu0 %v1136_v8 }
  0xa1   : > { %1020 = vmatmul.mubr.bf16.vlgmr.msra.gmra.mrb[0].mxu0 %v1137_v9 }
 0x174   : > { %v525_v11 = vpop.f32.mrb[0].mxu0 }
 0x175   : > { %v526_v12 = vadd.f32 %v956_v10, %v525_v11  ;;  %v1021_v13 = vpop.f32.mrb[1].mxu0 }
 0x176   : > { %v528_v14 = vpop.f32.mrb[2].mxu0 }
 0x177   : > { %536 = vst [vmem:[#allocation4] sm:$0x1] %v526_v12  ;;  %543 = vst [vmem:[#allocation7] sm:$0xff] %v526_v12  ;;  %v529_v15 = vadd.f32 %v956_v10, %v528_v14  ;;  %v1022_v16 = vpop.f32.mrb[3].mxu0 }
 0x179   : > { %544 = vst [vmem:[#allocation7 + $0x8] sm:$0xff] %v529_v15 }
 0x17e   : > { %v966_v17 = vld [vmem:[#allocation4] ss:$0 sm:$0xff] }
 0x17f   : > { %v564_v18 = vsub.f32 %v526_v12, %v966_v17  ;;  %v565_v19 = vsub.f32 %v529_v15, %v966_v17 }
 0x181   : > { %v567_v20 = vmul.f32 0.0, %v565_v19  ;;  %v573_v22 = vmul.f32 %v564_v18, %v564_v18 }
 0x183   : > { %v569_v21 = vadd.f32 %v567_v20, %v564_v18  ;;  %v574_v23 = vmul.f32 %v567_v20, %v565_v19 }
 0x185   : > { %v575_v24 = vadd.f32 %v574_v23, %v573_v22  ;;  %571 = vst [vmem:[#allocation2] sm:$0xff] %v569_v21 }
 0x187   : > { %577 = vst [vmem:[#allocation3] sm:$0xff] %v575_v24 }
 0x188 PF: > { %p967_p2 = scmp.ne.s32.totalorder %s1314_s27, 1 }
 0x189   : > { %v1138_v25 = vld [vmem:[#allocation14] sm:$0xff] (!%p967_p2)   ;;  %v1334_v26 = vmov (!%p967_p2), 0.0   ;;  %v1139_v27 = vld [vmem:[#allocation14 + $0x8] sm:$0xff] (!%p967_p2)   ;;  %vm1335_vm1 = vmmov (!%p967_p2), 0   ;;  %v1140_v28 = vld [vmem:[#allocation14 + $0x10] sm:$0xff] (!%p967_p2)   ;;  %v608_v49 = vlaneseq (!%p967_p2) }
 0x18a   : > { %581 = sbr.rel (%p967_p2) target bundleno = 906 (0x38a), region = 80  ;;  %1023 = vmatprep.subr.bf16.mxu0 (!%p967_p2), %v1334_v26  ;;  %1039 = vmatprep.mubr.msk.bf16.mxu0 (!%p967_p2), %vm1335_vm1, %v1334_v26  ;;  %v1141_v32 = vld [vmem:[#allocation14 + $0x18] sm:$0xff] (!%p967_p2)   ;;  %v1142_v37 = vld [vmem:[#allocation14 + $0x20] sm:$0xff] (!%p967_p2)   ;;  %v1143_v42 = vld [vmem:[#allocation14 + $0x28] sm:$0xff] (!%p967_p2)  }
 0x18b   : > { %1024 = vmatpush3.bf16.msra.mxu0 (!%p967_p2), %v1138_v25  ;;  %v1144_v47 = vld [vmem:[#allocation14 + $0x30] sm:$0xff] (!%p967_p2)   ;;  %v1145_v52 = vld [vmem:[#allocation14 + $0x38] sm:$0xff] (!%p967_p2)   ;;  %v609_v53 = vshrl.u32 (!%p967_p2), %v608_v49, 7  ;;  %v605_v55 = vld [vmem:[#allocation4] sm:$0x1] (!%p967_p2) }
 0x18c   : > { %1025 = vmatprep.subr.bf16.mxu0 (!%p967_p2), %v1334_v26  ;;  %v586_v29 = vld [vmem:[#allocation2] sm:$0xff] (!%p967_p2)  ;;  %v585_v61 = vld [vmem:[#allocation7 + $0x8] sm:$0xff] (!%p967_p2) }
 0x18d   : > { %v587_v30 = vrot.slane (!%p967_p2), %v586_v29, 4  ;;  %v610_v58 = vsub.s32 (!%p967_p2), 0, %v609_v53  ;;  %v584_v60 = vld [vmem:[#allocation7] sm:$0xff] (!%p967_p2)  ;;  %v968_v1 = vld [vmem:[%s1590_s4] ss:$0 sm:$0xff] (!%p967_p2)  ;;  %v753_v13 = vld [vmem:[#allocation11 + $0x8] sm:$0xff] (!%p967_p2) }
 0x18e   : > { %v593_v31 = vld [vmem:[#allocation3] sm:$0xff] (!%p967_p2)  ;;  %v969_v4 = vld [vmem:[%s1591_s5] ss:$0 sm:$0xff] (!%p967_p2)  ;;  %vm755_vm3 = vcmp.ge.f32.partialorder (!%p967_p2), %v753_v13, 0.0 }
 0x18f   : > { %1026 = vmatpush3.bf16.msra.mxu0 (!%p967_p2), %v1139_v27  ;;  %v594_v33 = vrot.slane (!%p967_p2), %v593_v31, 4  ;;  %v588_v34 = vadd.f32 (!%p967_p2), %v587_v30, %v586_v29  ;;  %v752_v12 = vld [vmem:[#allocation11] sm:$0xff] (!%p967_p2)  ;;  %v980_v15 = vsel (!%p967_p2), %vm755_vm3, 1.0, %v1334_v26  ;;  %v800_v16 = vld [vmem:[#allocation6] sm:$0xff] (!%p967_p2) }
 0x190   : > { %1027 = vmatprep.subr.bf16.mxu0 (!%p967_p2), %v1334_v26  ;;  %vm754_vm2 = vcmp.ge.f32.partialorder (!%p967_p2), %v752_v12, 0.0  ;;  %v970_v19 = vld [vmem:[%s1593_s7] ss:$0 sm:$0xff] (!%p967_p2) }
 0x191   : > { %v595_v35 = vadd.f32 %v594_v33, %v593_v31  ;;  %v589_v36 = vrot.slane %v588_v34, 2  ;;  %v979_v14 = vsel %vm754_vm2, 1.0, %v1334_v26 }
 0x192   : > { %v801_v17 = vadd.f32 %v980_v15, %v979_v14 }
 0x193   : > { %1028 = vmatpush3.bf16.msra.mxu0 %v1140_v28  ;;  %v596_v38 = vrot.slane %v595_v35, 2  ;;  %v590_v39 = vadd.f32 %v589_v36, %v588_v34 }
 0x194   : > { %1029 = vmatprep.subr.bf16.mxu0 %v1334_v26  ;;  %v802_v18 = vadd.f32 %v801_v17, %v800_v16 }
 0x195   : > { %v597_v40 = vadd.f32 %v596_v38, %v595_v35  ;;  %v591_v41 = vrot.slane %v590_v39, 1 }
 0x196   : > { %803 = vst [vmem:[#allocation6] sm:$0xff] %v802_v18 }
 0x197   : > { %1030 = vmatpush3.bf16.msra.mxu0 %v1141_v32  ;;  %v598_v43 = vrot.slane %v597_v40, 1  ;;  %v592_v44 = vadd.f32 %v591_v41, %v590_v39 }
 0x198   : > { %1031 = vmatprep.subr.bf16.mxu0 %v1334_v26 }
 0x199   : > { %v599_v45 = vadd.f32 %v598_v43, %v597_v40  ;;  %v600_v46 = vmul.f32 0.125, %v592_v44 }
 0x19b   : > { %1032 = vmatpush3.bf16.msra.mxu0 %v1142_v37  ;;  %v601_v48 = vmul.f32 0.125, %v599_v45  ;;  %v602_v50 = vmul.f32 %v600_v46, %v600_v46  ;;  %v606_v57 = vadd.f32 %v605_v55, %v600_v46 }
 0x19c   : > { %1033 = vmatprep.subr.bf16.mxu0 %v1334_v26 }
 0x19d   : > { %v603_v51 = vsub.f32 %v601_v48, %v602_v50  ;;  %v611_v59 = vrot.slane %v606_v57, %v610_v58 }
 0x19f   : > { %1034 = vmatpush3.bf16.msra.mxu0 %v1143_v42  ;;  %v604_v54 = vmax.f32 %v603_v51, 0.0  ;;  %v613_v62 = vsub.f32 %v584_v60, %v611_v59  ;;  %v614_v63 = vsub.f32 %v585_v61, %v611_v59  ;;  %v794_v60 = vld [vmem:[#allocation5] sm:$0xff] }
 0x1a0   : > { %1035 = vmatprep.subr.bf16.mxu0 %v1334_v26 }
 0x1a1   : > { %v615_v56 = vadd.f32 1e-05, %v604_v54 }
 0x1a3   : > { %1036 = vmatpush3.bf16.msra.mxu0 %v1144_v47  ;;  %1146 = vrsqrt.f32 %v615_v56 }
 0x1a4   : > { %1037 = vmatprep.subr.bf16.mxu0 %v1334_v26 }
 0x1a7   : > { %1038 = vmatpush3.bf16.msra.mxu0 %v1145_v52 }
 0x1ad   : > { %v1147_v0 = vpop.eup %1146 }
 0x1ae   : > { %v617_v2 = vmul.f32 %v1147_v0, %v613_v62  ;;  %v618_v3 = vmul.f32 %v1147_v0, %v614_v63 }
 0x1b0   : > { %v626_v5 = vmul.f32 %v968_v1, %v617_v2  ;;  %v627_v6 = vmul.f32 %v968_v1, %v618_v3 }
 0x1b2   : > { %v635_v7 = vadd.f32 %v969_v4, %v626_v5  ;;  %v636_v8 = vadd.f32 %v969_v4, %v627_v6 }
 0x1b4   : > { %v637_v9 = vmax.f32 %v635_v7, 0.0  ;;  %v638_v10 = vmax.f32 %v636_v8, 0.0 }
 0x1b6   : > { %v639_v11 = vpack.c.bf16 %v638_v10, %v637_v9 }
 0x1b8   : > { %1040 = vmatmul.mubr.bf16.vlgmr.msra.gmra.mrb[0].mxu0 %v639_v11 }
 0x28b   : > { %v745_v20 = vpop.f32.mrb[0].mxu0 }
 0x28c   : > { %v746_v21 = vadd.f32 %v970_v19, %v745_v20  ;;  %v1041_v22 = vpop.f32.mrb[1].mxu0 }
 0x28d   : > { %v748_v23 = vpop.f32.mrb[2].mxu0 }
 0x28e   : > { %v766_v24 = vand.u32 2147483647, %v746_v21  ;;  %v749_v25 = vadd.f32 %v970_v19, %v748_v23  ;;  %v1042_v27 = vpop.f32.mrb[3].mxu0  ;;  %v760_v40 = vmax.f32 %v746_v21, 0.0  ;;  %v762_v41 = vmul.f32 %v752_v12, %v746_v21 }
 0x290   : > { %v768_v28 = vsub.f32 0.0, %v766_v24  ;;  %v767_v29 = vand.u32 2147483647, %v749_v25  ;;  %v761_v43 = vmax.f32 %v749_v25, 0.0  ;;  %v763_v47 = vmul.f32 %v753_v13, %v749_v25 }
 0x291   : > { %v764_v50 = vsub.f32 %v760_v40, %v762_v41 }
 0x292   : > { %v770_v30 = vmul.f32 1.442695, %v768_v28  ;;  %v769_v31 = vsub.f32 0.0, %v767_v29  ;;  %v765_v55 = vsub.f32 %v761_v43, %v763_v47 }
 0x294   : > { %1148 = vpow2.f32 %v770_v30  ;;  %v772_v26 = vmul.f32 1.442695, %v769_v31 }
 0x296   : > { %1150 = vpow2.f32 %v772_v26 }
 0x29e   : > { %v1149_v32 = vpop.eup %1148 }
 0x29f   : > { %v774_v33 = vadd.f32 1.0, %v1149_v32  ;;  %v777_v36 = vmul.f32 -0.5, %v1149_v32  ;;  %v780_v39 = vand.u32 2147483647, %v1149_v32 }
 0x2a0   : > { %v1151_v34 = vpop.eup %1150 }
 0x2a1   : > { %1152 = vlog2.f32 %v774_v33  ;;  %v783_v35 = vadd.f32 1.0, %v1151_v34  ;;  %v786_v37 = vmul.f32 -0.5, %v1151_v34  ;;  %v778_v38 = vadd.f32 1.0, %v777_v36 }
 0x2a2   : > { %v789_v48 = vand.u32 2147483647, %v1151_v34  ;;  %vm781_vm4 = vcmp.lt.f32.partialorder %v780_v39, 0.0004427343 }
 0x2a3   : > { %1154 = vlog2.f32 %v783_v35  ;;  %v787_v44 = vadd.f32 1.0, %v786_v37  ;;  %v779_v46 = vmul.f32 %v1149_v32, %v778_v38 }
 0x2a4   : > { %vm790_vm5 = vcmp.lt.f32.partialorder %v789_v48, 0.0004427343 }
 0x2a5   : > { %v788_v53 = vmul.f32 %v1151_v34, %v787_v44 }
 0x2ab   : > { %v1153_v42 = vpop.eup %1152 }
 0x2ac   : > { %v776_v45 = vmul.f32 0.6931472, %v1153_v42 }
 0x2ad   : > { %v1155_v49 = vpop.eup %1154 }
 0x2ae   : > { %v782_v51 = vsel %vm781_vm4, %v779_v46, %v776_v45  ;;  %v785_v52 = vmul.f32 0.6931472, %v1155_v49 }
 0x2af   : > { %v792_v54 = vadd.f32 %v782_v51, %v764_v50 }
 0x2b0   : > { %v791_v56 = vsel %vm790_vm5, %v788_v53, %v785_v52 }
 0x2b1   : > { %v793_v57 = vadd.f32 %v791_v56, %v765_v55  ;;  %v795_v58 = vmul.f32 %v979_v14, %v792_v54 }
 0x2b3   : > { %v796_v59 = vmul.f32 %v980_v15, %v793_v57 }
 0x2b5   : > { %v797_v61 = vadd.f32 %v796_v59, %v795_v58 }
 0x2b7   : > { %v798_v62 = vadd.f32 %v797_v61, %v794_v60 }
 0x2b9   : > { %799 = vst [vmem:[#allocation5] sm:$0xff] %v798_v62  ;;  %809 = vadd.xlane.f32.xlu0 %v798_v62 }
 0x2bd   : > { %821 = vadd.xlane.f32.xlu0 %v802_v18 }
 0x346   : > { %v810_v63 = vpop.xlane.xlu0 %809 }
 0x347   : > { %v811_v0 = vrot.slane %v810_v63, 4 }
 0x349   : > { %v812_v1 = vadd.f32 %v811_v0, %v810_v63 }
 0x34a   : > { %v822_v2 = vpop.xlane.xlu0 %821 }
 0x34b   : > { %v813_v3 = vrot.slane %v812_v1, 2  ;;  %v823_v4 = vrot.slane %v822_v2, 4 }
 0x34d   : > { %v824_v5 = vadd.f32 %v823_v4, %v822_v2  ;;  %v814_v6 = vadd.f32 %v813_v3, %v812_v1 }
 0x34f   : > { %v825_v7 = vrot.slane %v824_v5, 2  ;;  %v815_v8 = vrot.slane %v814_v6, 1 }
 0x351   : > { %v826_v9 = vadd.f32 %v825_v7, %v824_v5  ;;  %v816_v10 = vadd.f32 %v815_v8, %v814_v6 }
 0x353   : > { %1043 = vpush %v816_v10  ;;  %v827_v11 = vrot.slane %v826_v9, 1 }
 0x355   : > { %v828_v12 = vadd.f32 %v827_v11, %v826_v9 }
 0x357   : > { %1045 = vpush %v828_v12 }
 0x384   : > { %s1044_s23 = spop %1043 }
 0x385   : > { %819 = sst [smem:[#allocation16]] %s1044_s23 }
 0x388   : > { %s1046_s26 = spop %1045 }
 0x389   : > { %831 = sst [smem:[#allocation16 + $0x1]] %s1046_s26 }
 0x38a PF: > { %p1090_p5 = scmp.eq.s32.totalorder %s1398_s30, 1  ;;  %s1268_s11 = scalar_lea.hbm %s1594_s8, 16 }
 0x38b   : > { %p1269_p3 = scmp.ne.s32.totalorder %s1594_s8, %s1268_s11  ;;  %p1274_p7 = scmp.lt.u32.totalorder %s1268_s11, %s1594_s8 }
 0x38d   : > { %p1270_p8 = pnand %p1269_p3, %p1090_p5 }
 0x38f   : > { %p1271_p6 = pneg %p1270_p8 }
 0x391   : > { %p1276_p9 = pnand %p1274_p7, %p1271_p6 }
 0x393   : > { %1279 = shalt.err (!%p1276_p9)
}
 0x394   : > { %s1336_s21 = smov [#allocation16]  }
 0x395   : > { %1064 = dma.smem_to_hbm (%p1090_p5), %s1336_s21, 16, %s1594_s8, [#allocation10]  }
 0x396   : > { %1309 = dma.done.wait (%p1090_p5), [#allocation10], 16  }
 0x397   : > { %1311 = vsyncadd (%p1090_p5), [#allocation10], 4294967280 }
 0x398   : > { %845 = sfence }
 0x399 PF: > { %s26_s29 = sadd.s32 1, %s1322_s29   ;;  %s1610_s27 = smov %s1318_s28 }
 0x39a   : > { %p23_p10 = scmp.ge.s32.totalorder %s26_s29, 4   ;;  %s1611_s28 = smov %s1613_s9 }
 0x39c   :  { %25 = sbr.rel (!%p23_p10) target bundleno = 7 (0x7), region = 130 }
 0x3a3   :  { %851 = vsyncpa [#allocation9], 1 }
 0x3a4   :  { %853 = vsyncpa [#allocation9 + $0x1], 1 }
 0x3a5   :  { %854 = vsyncpa [#allocation12], 1 }
 0x3a6   :  { %856 = vsyncpa [#allocation12 + $0x1], 1 }
 0x3a7   :  { %857 = vsyncpa [#allocation15], 1 }
 0x3a8   :  { %858 = vsyncpa [#allocation10], 1 }
 0x3a9   :  { %860 = vsyncpa [#allocation10 + $0x1], 1 }

// kernel: tpu_custom_call.1
= control target key start
LH: loop header
LB: loop body
LE: loop exit
PB: predicated region body
PF: predicated region fallthrough
CT: control target
= control target key end

     0   :  { %13 = vsyncpa [#allocation9], 0  ;;  %s1586_s0 = inlined_call_operand.hbm [shape: bf16[16,128], index: 0, kind: input, shape index: {}]   ;;  %s1587_s1 = inlined_call_operand.hbm [shape: f32[16,128], index: 1, kind: input, shape index: {}]   ;;  %s1588_s2 = inlined_call_operand.hbm [shape: bf16[128,128], index: 2, kind: input, shape index: {}]   ;;  %s1589_s3 = inlined_call_operand.vmem [shape: f32[1,128], index: 3, kind: input, shape index: {}]   ;;  %s1590_s4 = inlined_call_operand.vmem [shape: f32[1,128], index: 4, kind: input, shape index: {}]   ;;  %s1591_s5 = inlined_call_operand.vmem [shape: f32[1,128], index: 5, kind: input, shape index: {}]   ;;  %s1592_s6 = inlined_call_operand.hbm [shape: bf16[128,128], index: 6, kind: input, shape index: {}]   ;;  %s1593_s7 = inlined_call_operand.vmem [shape: f32[1,128], index: 7, kind: input, shape index: {}]   ;;  %s1594_s8 = inlined_call_operand.hbm [shape: f32[1,2], index: 8, kind: output, shape index: {}]  }
   0x1   :  { %15 = vsyncpa [#allocation9 + $0x1], 0 }
   0x2   :  { %16 = vsyncpa [#allocation12], 0 }
   0x3   :  { %18 = vsyncpa [#allocation12 + $0x1], 0 }
   0x4   :  { %19 = vsyncpa [#allocation15], 0 }
   0x5   :  { %20 = vsyncpa [#allocation10], 0  ;;  %s1382_s27 = smov 0   ;;  %s1384_s28 = smov 0  }
   0x6   :  { %s1386_s29 = smov 0  }
   0x7 LB: > { %s1398_s30 = sadd.s32 4294967295, %s1322_s29   ;;  %s38_s9 = sadd.s32 1, %s1318_s28  ;;  %s1322_s29 = sphi %s1386_s29, %s26_s29   ;;  %s1318_s28 = sphi %s1384_s28, %s1611_s28   ;;  %s1314_s27 = sphi %s1382_s27, %s1610_s27  }
   0x8   : > { %p40_p0 = scmp.ge.s32.totalorder %s38_s9, 2  ;;  %p944_p1 = scmp.ge.s32.totalorder %s1322_s29, 1 }
   0x9   : > { %p248_p2 = scmp.lt.s32.totalorder %s1322_s29, 3  ;;  %p1595_p4 = scmp.eq.s32.totalorder %s1398_s30, 0 }
   0xa   : > { %s1613_s9 = smov (%p40_p0, %s38_s9), 0  ;;  %s1324_s11 = smov [#allocation13]  }
   0xb   : > { %p1405_p3 = pnand %p944_p1, %p248_p2  ;;  %s260_s12 = sshll.u32 %s1324_s11, 4  ;;  %s261_s12 = int_to_ptr.vmem [resolvable:$true] %s260_s12 }
   0xc   : > { %s1325_s14 = smov [#allocation14]   ;;  %s1156_s18 = scalar_lea.hbm %s1588_s2, 1024 }
   0xd   : > { %s1597_s10 = scalar_select %p1405_p3, 1, 0 }
   0xe   : > { %p1067_p5 = pneg %p1405_p3  ;;  %s282_s15 = sshll.u32 %s1325_s14, 4  ;;  %s283_s15 = int_to_ptr.vmem [resolvable:$true] %s282_s15 }
   0xf   : > { %p1157_p7 = scmp.ne.s32.totalorder %s1588_s2, %s1156_s18  ;;  %p1163_p11 = scmp.lt.u32.totalorder %s1156_s18, %s1588_s2 }
  0x10   : > { %p1414_p6 = pnand %p1595_p4, %p1067_p5 }
  0x12   : > { %p1158_p8 = pneg %p1414_p6 }
  0x14   : > { %p1159_p9 = pnand %p1158_p8, %p1157_p7 }
  0x16   : > { %p1160_p10 = pneg %p1159_p9 }
  0x18   : > { %p1165_p12 = pnand %p1163_p11, %p1160_p10 }
  0x1a   : > { %1168 = shalt.err (!%p1165_p12)
}
  0x1b   : > { %s1169_s23 = scalar_lea.vmem %s261_s12, 1024  ;;  %p1177_p2 = scmp.lt.s32.totalorder %s261_s12, %s261_s12 }
  0x1c   : > { %p1170_p13 = scmp.ne.s32.totalorder %s261_s12, %s1169_s23  ;;  %p1178_p5 = scmp.lt.s32.totalorder %s1169_s23, %s1169_s23 }
  0x1e   : > { %p1172_p0 = pnand %p1170_p13, %p1158_p8  ;;  %p1179_p4 = por %p1178_p5, %p1177_p2 }
  0x20   : > { %p1173_p1 = pneg %p1172_p0 }
  0x22   : > { %p1180_p3 = pnand %p1179_p4, %p1173_p1 }
  0x24   : > { %1183 = shalt.err (!%p1180_p3)
}
  0x25   : > { %s1326_s24 = smov 64   ;;  %s1327_s25 = smov 4  }
  0x26   : > { %1070 = dma.hbm_to_vmem [thread:$0]  (!%p1414_p6), %s1588_s2, 1024, %s261_s12, [#allocation12], %s1326_s24, %s1326_s24, %s1327_s25  }
  0x27   : > { %s1184_s17 = scalar_lea.hbm %s1592_s6, 1024 }
  0x28   : > { %p1185_p3 = scmp.ne.s32.totalorder %s1592_s6, %s1184_s17  ;;  %p1191_p10 = scmp.lt.u32.totalorder %s1184_s17, %s1592_s6 }
  0x2a   : > { %p1187_p4 = pnand %p1185_p3, %p1158_p8 }
  0x2c   : > { %p1188_p9 = pneg %p1187_p4 }
  0x2e   : > { %p1193_p11 = pnand %p1191_p10, %p1188_p9 }
  0x30   : > { %1196 = shalt.err (!%p1193_p11)
}
  0x31   : > { %s1197_s12 = scalar_lea.vmem %s283_s15, 1024  ;;  %p1205_p1 = scmp.lt.s32.totalorder %s283_s15, %s283_s15 }
  0x32   : > { %p1198_p12 = scmp.ne.s32.totalorder %s283_s15, %s1197_s12  ;;  %p1206_p2 = scmp.lt.s32.totalorder %s1197_s12, %s1197_s12 }
  0x34   : > { %p1200_p13 = pnand %p1198_p12, %p1158_p8  ;;  %p1207_p5 = por %p1206_p2, %p1205_p1 }
  0x36   : > { %p1201_p0 = pneg %p1200_p13 }
  0x38   : > { %p1208_p7 = pnand %p1207_p5, %p1201_p0 }
  0x3a   : > { %1211 = shalt.err (!%p1208_p7)
}
  0x3b   : > { %1073 = dma.hbm_to_vmem [thread:$0]  (!%p1414_p6), %s1592_s6, 1024, %s283_s15, [#allocation15], %s1326_s24, %s1326_s24, %s1327_s25  }
  0x3c   : > { %p1084_p3 = scmp.eq.s32.totalorder %s1322_s29, 0  ;;  %s1328_s26 = smov [#allocation8]  }
  0x3d   : > { %s312_s11 = sshll.u32 %s1328_s26, 4  ;;  %s322_s14 = sand.u32 1, %s1322_s29   ;;  %s313_s11 = int_to_ptr.vmem [resolvable:$true] %s312_s11 }
  0x3e   : > { %p1599_p8 = scmp.lt.s32.totalorder %s1322_s29, 2  ;;  %s1329_s13 = smov [#allocation11]  }
  0x3f   : > { %s334_s17 = sshll.u32 %s1329_s13, 4  ;;  %s1212_s20 = scalar_lea.hbm %s1586_s0, 128  ;;  %s335_s17 = int_to_ptr.vmem [resolvable:$true] %s334_s17 }
  0x40   : > { %p1471_p4 = pnand %p1084_p3, %p1599_p8  ;;  %p1213_p6 = scmp.ne.s32.totalorder %s1586_s0, %s1212_s20 }
  0x41   : > { %p1219_p11 = scmp.lt.u32.totalorder %s1212_s20, %s1586_s0 }
  0x42   : > { %p1214_p7 = pneg %p1471_p4 }
  0x44   : > { %p1215_p9 = pnand %p1214_p7, %p1213_p6 }
  0x46   : > { %p1216_p10 = pneg %p1215_p9 }
  0x48   : > { %p1221_p12 = pnand %p1219_p11, %p1216_p10 }
  0x4a   : > { %1224 = shalt.err (!%p1221_p12)
}
  0x4b   : > { %s1225_s23 = scalar_lea.vmem %s313_s11, 128  ;;  %s1232_s26 = scalar_lea.vmem %s313_s11, 256 }
  0x4c   : > { %p1226_p13 = scmp.ne.s32.totalorder %s313_s11, %s1225_s23  ;;  %p1233_p2 = scmp.lt.s32.totalorder %s313_s11, %s313_s11 }
  0x4d   : > { %p1234_p5 = scmp.lt.s32.totalorder %s1232_s26, %s1225_s23 }
  0x4e   : > { %p1228_p0 = pnand %p1226_p13, %p1214_p7 }
  0x4f   : > { %p1235_p3 = por %p1234_p5, %p1233_p2 }
  0x50   : > { %p1229_p1 = pneg %p1228_p0 }
  0x52   : > { %p1236_p8 = pnand %p1235_p3, %p1229_p1 }
  0x54   : > { %1239 = shalt.err (!%p1236_p8)
}
  0x55   : > { %1077 = dma.hbm_to_vmem [thread:$0]  (!%p1471_p4), %s1586_s0, 128, %s313_s11, [#allocation9], %s1326_s24, %s1326_s24, %s1327_s25  }
  0x56   : > { %s323_s19 = scalar_lea.sflag [#allocation12], %s322_s14  ;;  %s1240_s15 = scalar_lea.hbm %s1587_s1, 256 }
  0x57   : > { %p1241_p6 = scmp.ne.s32.totalorder %s1587_s1, %s1240_s15  ;;  %p1247_p11 = scmp.lt.u32.totalorder %s1240_s15, %s1587_s1 }
  0x59   : > { %p1243_p9 = pnand %p1241_p6, %p1214_p7 }
  0x5b   : > { %p1244_p10 = pneg %p1243_p9 }
  0x5d   : > { %p1249_p12 = pnand %p1247_p11, %p1244_p10 }
  0x5f   : > { %1252 = shalt.err (!%p1249_p12)
}
  0x60   : > { %s1253_s24 = scalar_lea.vmem %s335_s17, 256  ;;  %s1260_s25 = scalar_lea.vmem %s335_s17, 512 }
  0x61   : > { %p1254_p13 = scmp.ne.s32.totalorder %s335_s17, %s1253_s24  ;;  %p1261_p2 = scmp.lt.s32.totalorder %s335_s17, %s335_s17 }
  0x62   : > { %p1262_p5 = scmp.lt.s32.totalorder %s1260_s25, %s1253_s24 }
  0x63   : > { %p1256_p0 = pnand %p1254_p13, %p1214_p7 }
  0x64   : > { %p1263_p3 = por %p1262_p5, %p1261_p2 }
  0x65   : > { %p1257_p1 = pneg %p1256_p0 }
  0x67   : > { %p1264_p8 = pnand %p1263_p3, %p1257_p1 }
  0x69   : > { %1267 = shalt.err (!%p1264_p8)
}
  0x6a   : > { %s1330_s11 = smov 128   ;;  %s1331_s14 = smov 8  }
  0x6b   : > { %1080 = dma.hbm_to_vmem [thread:$0]  (!%p1471_p4), %s1587_s1, 256, %s335_s17, %s323_s19, %s1330_s11, %s1330_s11, %s1331_s14  }
  0x6c   : > { %p1601_p6 = scmp.ne.s32.totalorder %s1597_s10, 0 }
  0x6d   : > { %p1602_p7 = scmp.eq.s32.totalorder (!%p1601_p6), %s1398_s30, 0 }
  0x6e   : > { %346 = sbr.rel (%p1601_p6) target bundleno = 921 (0x399), region = 52 }
  0x75   : > { %1293 = dma.done.wait (%p1602_p7), [#allocation9], 128   ;;  %p1603_p9 = pmov %p1602_p7 }
  0x76   : > { %s357_s20 = sand.u32 1, %s1398_s30   ;;  %p1604_p10 = pmov %p1602_p7 }
  0x77   : > { %1295 = vsyncadd (%p1603_p9), [#allocation9], 4294967168  ;;  %s358_s21 = scalar_lea.sflag [#allocation12], %s357_s20 }
  0x78   : > { %1297 = dma.done.wait (%p1604_p10), %s358_s21, 256   ;;  %p1605_p11 = pmov %p1602_p7 }
  0x79   : > { %p1606_p4 = pmov %p1602_p7 }
  0x7a   : > { %1299 = vsyncadd (%p1605_p11), %s358_s21, 4294967040 }
  0x7b   : > { %1301 = dma.done.wait (%p1606_p4), [#allocation12], 1024   ;;  %p1607_p12 = pmov %p1606_p4 }
  0x7c   : > { %p1608_p13 = pmov %p1606_p4 }
  0x7d   : > { %1303 = vsyncadd (%p1607_p12), [#allocation12], 4294966272 }
  0x7e   : > { %1305 = dma.done.wait (%p1608_p13), [#allocation15], 1024   ;;  %p1609_p0 = pmov %p1606_p4 }
  0x7f   : > { %p955_p1 = scmp.ne.s32.totalorder %s1314_s27, 0 }
  0x80   : > { %1307 = vsyncadd (%p1609_p0), [#allocation15], 4294966272  ;;  %v1129_v0 = vld [vmem:[#allocation13] sm:$0xff] (!%p955_p1)   ;;  %v1332_v1 = vmov (!%p955_p1), 0.0   ;;  %v1130_v2 = vld [vmem:[#allocation13 + $0x8] sm:$0xff] (!%p955_p1)   ;;  %vm1333_vm0 = vmmov (!%p955_p1), 0  }
  0x81   : > { %411 = sbr.rel (%p955_p1) target bundleno = 392 (0x188), region = 72  ;;  %1003 = vmatprep.subr.bf16.mxu0 (!%p955_p1), %v1332_v1  ;;  %539 = vst [vmem:[#allocation5] sm:$0xff] (!%p955_p1), %v1332_v1  ;;  %540 = vst [vmem:[#allocation6] sm:$0xff] (!%p955_p1), %v1332_v1  ;;  %1019 = vmatprep.mubr.msk.bf16.mxu0 (!%p955_p1), %vm1333_vm0, %v1332_v1  ;;  %v1131_v3 = vld [vmem:[#allocation13 + $0x10] sm:$0xff] (!%p955_p1)   ;;  %v1132_v4 = vld [vmem:[#allocation13 + $0x18] sm:$0xff] (!%p955_p1)  }
  0x82   : > { %1004 = vmatpush3.bf16.msra.mxu0 (!%p955_p1), %v1129_v0  ;;  %v1133_v5 = vld [vmem:[#allocation13 + $0x20] sm:$0xff] (!%p955_p1)   ;;  %v1134_v6 = vld [vmem:[#allocation13 + $0x28] sm:$0xff] (!%p955_p1)   ;;  %v1135_v7 = vld [vmem:[#allocation13 + $0x30] sm:$0xff] (!%p955_p1)  }
  0x83   : > { %1005 = vmatprep.subr.bf16.mxu0 (!%p955_p1), %v1332_v1  ;;  %v1136_v8 = vld [vmem:[#allocation13 + $0x38] sm:$0xff] (!%p955_p1)   ;;  %v1137_v9 = vld [vmem:[#allocation8] sm:$0xff] (!%p955_p1)  }
  0x84   : > { %v956_v10 = vld [vmem:[%s1589_s3] ss:$0 sm:$0xff] (!%p955_p1) }
  0x86   : > { %1006 = vmatpush3.bf16.msra.mxu0 (!%p955_p1), %v1130_v2 }
  0x87   : > { %1007 = vmatprep.subr.bf16.mxu0 (!%p955_p1), %v1332_v1 }
  0x8a   : > { %1008 = vmatpush3.bf16.msra.mxu0 %v1131_v3 }
  0x8b   : > { %1009 = vmatprep.subr.bf16.mxu0 %v1332_v1 }
  0x8e   : > { %1010 = vmatpush3.bf16.msra.mxu0 %v1132_v4 }
  0x8f   : > { %1011 = vmatprep.subr.bf16.mxu0 %v1332_v1 }
  0x92   : > { %1012 = vmatpush3.bf16.msra.mxu0 %v1133_v5 }
  0x93   : > { %1013 = vmatprep.subr.bf16.mxu0 %v1332_v1 }
  0x96   : > { %1014 = vmatpush3.bf16.msra.mxu0 %v1134_v6 }
  0x97   : > { %1015 = vmatprep.subr.bf16.mxu0 %v1332_v1 }
  0x9a   : > { %1016 = vmatpush3.bf16.msra.mxu0 %v1135_v7 }
  0x9b   : > { %1017 = vmatprep.subr.bf16.mxu0 %v1332_v1 }
  0x9e   : > { %1018 = vmatpush3.bf16.msra.mxu0 %v1136_v8 }
  0xa1   : > { %1020 = vmatmul.mubr.bf16.vlgmr.msra.gmra.mrb[0].mxu0 %v1137_v9 }
 0x174   : > { %v525_v11 = vpop.f32.mrb[0].mxu0 }
 0x175   : > { %v526_v12 = vadd.f32 %v956_v10, %v525_v11  ;;  %v1021_v13 = vpop.f32.mrb[1].mxu0 }
 0x176   : > { %v528_v14 = vpop.f32.mrb[2].mxu0 }
 0x177   : > { %536 = vst [vmem:[#allocation4] sm:$0x1] %v526_v12  ;;  %543 = vst [vmem:[#allocation7] sm:$0xff] %v526_v12  ;;  %v529_v15 = vadd.f32 %v956_v10, %v528_v14  ;;  %v1022_v16 = vpop.f32.mrb[3].mxu0 }
 0x179   : > { %544 = vst [vmem:[#allocation7 + $0x8] sm:$0xff] %v529_v15 }
 0x17e   : > { %v966_v17 = vld [vmem:[#allocation4] ss:$0 sm:$0xff] }
 0x17f   : > { %v564_v18 = vsub.f32 %v526_v12, %v966_v17  ;;  %v565_v19 = vsub.f32 %v529_v15, %v966_v17 }
 0x181   : > { %v567_v20 = vmul.f32 0.0, %v565_v19  ;;  %v573_v22 = vmul.f32 %v564_v18, %v564_v18 }
 0x183   : > { %v569_v21 = vadd.f32 %v567_v20, %v564_v18  ;;  %v574_v23 = vmul.f32 %v567_v20, %v565_v19 }
 0x185   : > { %v575_v24 = vadd.f32 %v574_v23, %v573_v22  ;;  %571 = vst [vmem:[#allocation2] sm:$0xff] %v569_v21 }
 0x187   : > { %577 = vst [vmem:[#allocation3] sm:$0xff] %v575_v24 }
 0x188 PF: > { %p967_p2 = scmp.ne.s32.totalorder %s1314_s27, 1 }
 0x189   : > { %v1138_v25 = vld [vmem:[#allocation14] sm:$0xff] (!%p967_p2)   ;;  %v1334_v26 = vmov (!%p967_p2), 0.0   ;;  %v1139_v27 = vld [vmem:[#allocation14 + $0x8] sm:$0xff] (!%p967_p2)   ;;  %vm1335_vm1 = vmmov (!%p967_p2), 0   ;;  %v1140_v28 = vld [vmem:[#allocation14 + $0x10] sm:$0xff] (!%p967_p2)   ;;  %v608_v49 = vlaneseq (!%p967_p2) }
 0x18a   : > { %581 = sbr.rel (%p967_p2) target bundleno = 906 (0x38a), region = 80  ;;  %1023 = vmatprep.subr.bf16.mxu0 (!%p967_p2), %v1334_v26  ;;  %1039 = vmatprep.mubr.msk.bf16.mxu0 (!%p967_p2), %vm1335_vm1, %v1334_v26  ;;  %v1141_v32 = vld [vmem:[#allocation14 + $0x18] sm:$0xff] (!%p967_p2)   ;;  %v1142_v37 = vld [vmem:[#allocation14 + $0x20] sm:$0xff] (!%p967_p2)   ;;  %v1143_v42 = vld [vmem:[#allocation14 + $0x28] sm:$0xff] (!%p967_p2)  }
 0x18b   : > { %1024 = vmatpush3.bf16.msra.mxu0 (!%p967_p2), %v1138_v25  ;;  %v1144_v47 = vld [vmem:[#allocation14 + $0x30] sm:$0xff] (!%p967_p2)   ;;  %v1145_v52 = vld [vmem:[#allocation14 + $0x38] sm:$0xff] (!%p967_p2)   ;;  %v609_v53 = vshrl.u32 (!%p967_p2), %v608_v49, 7  ;;  %v605_v55 = vld [vmem:[#allocation4] sm:$0x1] (!%p967_p2) }
 0x18c   : > { %1025 = vmatprep.subr.bf16.mxu0 (!%p967_p2), %v1334_v26  ;;  %v586_v29 = vld [vmem:[#allocation2] sm:$0xff] (!%p967_p2)  ;;  %v585_v61 = vld [vmem:[#allocation7 + $0x8] sm:$0xff] (!%p967_p2) }
 0x18d   : > { %v587_v30 = vrot.slane (!%p967_p2), %v586_v29, 4  ;;  %v610_v58 = vsub.s32 (!%p967_p2), 0, %v609_v53  ;;  %v584_v60 = vld [vmem:[#allocation7] sm:$0xff] (!%p967_p2)  ;;  %v968_v1 = vld [vmem:[%s1590_s4] ss:$0 sm:$0xff] (!%p967_p2)  ;;  %v753_v13 = vld [vmem:[#allocation11 + $0x8] sm:$0xff] (!%p967_p2) }
 0x18e   : > { %v593_v31 = vld [vmem:[#allocation3] sm:$0xff] (!%p967_p2)  ;;  %v969_v4 = vld [vmem:[%s1591_s5] ss:$0 sm:$0xff] (!%p967_p2)  ;;  %vm755_vm3 = vcmp.ge.f32.partialorder (!%p967_p2), %v753_v13, 0.0 }
 0x18f   : > { %1026 = vmatpush3.bf16.msra.mxu0 (!%p967_p2), %v1139_v27  ;;  %v594_v33 = vrot.slane (!%p967_p2), %v593_v31, 4  ;;  %v588_v34 = vadd.f32 (!%p967_p2), %v587_v30, %v586_v29  ;;  %v752_v12 = vld [vmem:[#allocation11] sm:$0xff] (!%p967_p2)  ;;  %v980_v15 = vsel (!%p967_p2), %vm755_vm3, 1.0, %v1334_v26  ;;  %v800_v16 = vld [vmem:[#allocation6] sm:$0xff] (!%p967_p2) }
 0x190   : > { %1027 = vmatprep.subr.bf16.mxu0 (!%p967_p2), %v1334_v26  ;;  %vm754_vm2 = vcmp.ge.f32.partialorder (!%p967_p2), %v752_v12, 0.0  ;;  %v970_v19 = vld [vmem:[%s1593_s7] ss:$0 sm:$0xff] (!%p967_p2) }
 0x191   : > { %v595_v35 = vadd.f32 %v594_v33, %v593_v31  ;;  %v589_v36 = vrot.slane %v588_v34, 2  ;;  %v979_v14 = vsel %vm754_vm2, 1.0, %v1334_v26 }
 0x192   : > { %v801_v17 = vadd.f32 %v980_v15, %v979_v14 }
 0x193   : > { %1028 = vmatpush3.bf16.msra.mxu0 %v1140_v28  ;;  %v596_v38 = vrot.slane %v595_v35, 2  ;;  %v590_v39 = vadd.f32 %v589_v36, %v588_v34 }
 0x194   : > { %1029 = vmatprep.subr.bf16.mxu0 %v1334_v26  ;;  %v802_v18 = vadd.f32 %v801_v17, %v800_v16 }
 0x195   : > { %v597_v40 = vadd.f32 %v596_v38, %v595_v35  ;;  %v591_v41 = vrot.slane %v590_v39, 1 }
 0x196   : > { %803 = vst [vmem:[#allocation6] sm:$0xff] %v802_v18 }
 0x197   : > { %1030 = vmatpush3.bf16.msra.mxu0 %v1141_v32  ;;  %v598_v43 = vrot.slane %v597_v40, 1  ;;  %v592_v44 = vadd.f32 %v591_v41, %v590_v39 }
 0x198   : > { %1031 = vmatprep.subr.bf16.mxu0 %v1334_v26 }
 0x199   : > { %v599_v45 = vadd.f32 %v598_v43, %v597_v40  ;;  %v600_v46 = vmul.f32 0.125, %v592_v44 }
 0x19b   : > { %1032 = vmatpush3.bf16.msra.mxu0 %v1142_v37  ;;  %v601_v48 = vmul.f32 0.125, %v599_v45  ;;  %v602_v50 = vmul.f32 %v600_v46, %v600_v46  ;;  %v606_v57 = vadd.f32 %v605_v55, %v600_v46 }
 0x19c   : > { %1033 = vmatprep.subr.bf16.mxu0 %v1334_v26 }
 0x19d   : > { %v603_v51 = vsub.f32 %v601_v48, %v602_v50  ;;  %v611_v59 = vrot.slane %v606_v57, %v610_v58 }
 0x19f   : > { %1034 = vmatpush3.bf16.msra.mxu0 %v1143_v42  ;;  %v604_v54 = vmax.f32 %v603_v51, 0.0  ;;  %v613_v62 = vsub.f32 %v584_v60, %v611_v59  ;;  %v614_v63 = vsub.f32 %v585_v61, %v611_v59  ;;  %v794_v60 = vld [vmem:[#allocation5] sm:$0xff] }
 0x1a0   : > { %1035 = vmatprep.subr.bf16.mxu0 %v1334_v26 }
 0x1a1   : > { %v615_v56 = vadd.f32 1e-05, %v604_v54 }
 0x1a3   : > { %1036 = vmatpush3.bf16.msra.mxu0 %v1144_v47  ;;  %1146 = vrsqrt.f32 %v615_v56 }
 0x1a4   : > { %1037 = vmatprep.subr.bf16.mxu0 %v1334_v26 }
 0x1a7   : > { %1038 = vmatpush3.bf16.msra.mxu0 %v1145_v52 }
 0x1ad   : > { %v1147_v0 = vpop.eup %1146 }
 0x1ae   : > { %v617_v2 = vmul.f32 %v1147_v0, %v613_v62  ;;  %v618_v3 = vmul.f32 %v1147_v0, %v614_v63 }
 0x1b0   : > { %v626_v5 = vmul.f32 %v968_v1, %v617_v2  ;;  %v627_v6 = vmul.f32 %v968_v1, %v618_v3 }
 0x1b2   : > { %v635_v7 = vadd.f32 %v969_v4, %v626_v5  ;;  %v636_v8 = vadd.f32 %v969_v4, %v627_v6 }
 0x1b4   : > { %v637_v9 = vmax.f32 %v635_v7, 0.0  ;;  %v638_v10 = vmax.f32 %v636_v8, 0.0 }
 0x1b6   : > { %v639_v11 = vpack.c.bf16 %v638_v10, %v637_v9 }
 0x1b8   : > { %1040 = vmatmul.mubr.bf16.vlgmr.msra.gmra.mrb[0].mxu0 %v639_v11 }
 0x28b   : > { %v745_v20 = vpop.f32.mrb[0].mxu0 }
 0x28c   : > { %v746_v21 = vadd.f32 %v970_v19, %v745_v20  ;;  %v1041_v22 = vpop.f32.mrb[1].mxu0 }
 0x28d   : > { %v748_v23 = vpop.f32.mrb[2].mxu0 }
 0x28e   : > { %v766_v24 = vand.u32 2147483647, %v746_v21  ;;  %v749_v25 = vadd.f32 %v970_v19, %v748_v23  ;;  %v1042_v27 = vpop.f32.mrb[3].mxu0  ;;  %v760_v40 = vmax.f32 %v746_v21, 0.0  ;;  %v762_v41 = vmul.f32 %v752_v12, %v746_v21 }
 0x290   : > { %v768_v28 = vsub.f32 0.0, %v766_v24  ;;  %v767_v29 = vand.u32 2147483647, %v749_v25  ;;  %v761_v43 = vmax.f32 %v749_v25, 0.0  ;;  %v763_v47 = vmul.f32 %v753_v13, %v749_v25 }
 0x291   : > { %v764_v50 = vsub.f32 %v760_v40, %v762_v41 }
 0x292   : > { %v770_v30 = vmul.f32 1.442695, %v768_v28  ;;  %v769_v31 = vsub.f32 0.0, %v767_v29  ;;  %v765_v55 = vsub.f32 %v761_v43, %v763_v47 }
 0x294   : > { %1148 = vpow2.f32 %v770_v30  ;;  %v772_v26 = vmul.f32 1.442695, %v769_v31 }
 0x296   : > { %1150 = vpow2.f32 %v772_v26 }
 0x29e   : > { %v1149_v32 = vpop.eup %1148 }
 0x29f   : > { %v774_v33 = vadd.f32 1.0, %v1149_v32  ;;  %v777_v36 = vmul.f32 -0.5, %v1149_v32  ;;  %v780_v39 = vand.u32 2147483647, %v1149_v32 }
 0x2a0   : > { %v1151_v34 = vpop.eup %1150 }
 0x2a1   : > { %1152 = vlog2.f32 %v774_v33  ;;  %v783_v35 = vadd.f32 1.0, %v1151_v34  ;;  %v786_v37 = vmul.f32 -0.5, %v1151_v34  ;;  %v778_v38 = vadd.f32 1.0, %v777_v36 }
 0x2a2   : > { %v789_v48 = vand.u32 2147483647, %v1151_v34  ;;  %vm781_vm4 = vcmp.lt.f32.partialorder %v780_v39, 0.0004427343 }
 0x2a3   : > { %1154 = vlog2.f32 %v783_v35  ;;  %v787_v44 = vadd.f32 1.0, %v786_v37  ;;  %v779_v46 = vmul.f32 %v1149_v32, %v778_v38 }
 0x2a4   : > { %vm790_vm5 = vcmp.lt.f32.partialorder %v789_v48, 0.0004427343 }
 0x2a5   : > { %v788_v53 = vmul.f32 %v1151_v34, %v787_v44 }
 0x2ab   : > { %v1153_v42 = vpop.eup %1152 }
 0x2ac   : > { %v776_v45 = vmul.f32 0.6931472, %v1153_v42 }
 0x2ad   : > { %v1155_v49 = vpop.eup %1154 }
 0x2ae   : > { %v782_v51 = vsel %vm781_vm4, %v779_v46, %v776_v45  ;;  %v785_v52 = vmul.f32 0.6931472, %v1155_v49 }
 0x2af   : > { %v792_v54 = vadd.f32 %v782_v51, %v764_v50 }
 0x2b0   : > { %v791_v56 = vsel %vm790_vm5, %v788_v53, %v785_v52 }
 0x2b1   : > { %v793_v57 = vadd.f32 %v791_v56, %v765_v55  ;;  %v795_v58 = vmul.f32 %v979_v14, %v792_v54 }
 0x2b3   : > { %v796_v59 = vmul.f32 %v980_v15, %v793_v57 }
 0x2b5   : > { %v797_v61 = vadd.f32 %v796_v59, %v795_v58 }
 0x2b7   : > { %v798_v62 = vadd.f32 %v797_v61, %v794_v60 }
 0x2b9   : > { %799 = vst [vmem:[#allocation5] sm:$0xff] %v798_v62  ;;  %809 = vadd.xlane.f32.xlu0 %v798_v62 }
 0x2bd   : > { %821 = vadd.xlane.f32.xlu0 %v802_v18 }
 0x346   : > { %v810_v63 = vpop.xlane.xlu0 %809 }
 0x347   : > { %v811_v0 = vrot.slane %v810_v63, 4 }
 0x349   : > { %v812_v1 = vadd.f32 %v811_v0, %v810_v63 }
 0x34a   : > { %v822_v2 = vpop.xlane.xlu0 %821 }
 0x34b   : > { %v813_v3 = vrot.slane %v812_v1, 2  ;;  %v823_v4 = vrot.slane %v822_v2, 4 }
 0x34d   : > { %v824_v5 = vadd.f32 %v823_v4, %v822_v2  ;;  %v814_v6 = vadd.f32 %v813_v3, %v812_v1 }
 0x34f   : > { %v825_v7 = vrot.slane %v824_v5, 2  ;;  %v815_v8 = vrot.slane %v814_v6, 1 }
 0x351   : > { %v826_v9 = vadd.f32 %v825_v7, %v824_v5  ;;  %v816_v10 = vadd.f32 %v815_v8, %v814_v6 }
 0x353   : > { %1043 = vpush %v816_v10  ;;  %v827_v11 = vrot.slane %v826_v9, 1 }
 0x355   : > { %v828_v12 = vadd.f32 %v827_v11, %v826_v9 }
 0x357   : > { %1045 = vpush %v828_v12 }
 0x384   : > { %s1044_s23 = spop %1043 }
 0x385   : > { %819 = sst [smem:[#allocation16]] %s1044_s23 }
 0x388   : > { %s1046_s26 = spop %1045 }
 0x389   : > { %831 = sst [smem:[#allocation16 + $0x1]] %s1046_s26 }
 0x38a PF: > { %p1090_p5 = scmp.eq.s32.totalorder %s1398_s30, 1  ;;  %s1268_s11 = scalar_lea.hbm %s1594_s8, 16 }
 0x38b   : > { %p1269_p3 = scmp.ne.s32.totalorder %s1594_s8, %s1268_s11  ;;  %p1274_p7 = scmp.lt.u32.totalorder %s1268_s11, %s1594_s8 }
 0x38d   : > { %p1270_p8 = pnand %p1269_p3, %p1090_p5 }
 0x38f   : > { %p1271_p6 = pneg %p1270_p8 }
 0x391   : > { %p1276_p9 = pnand %p1274_p7, %p1271_p6 }
 0x393   : > { %1279 = shalt.err (!%p1276_p9)
}
 0x394   : > { %s1336_s21 = smov [#allocation16]  }
 0x395   : > { %1064 = dma.smem_to_hbm (%p1090_p5), %s1336_s21, 16, %s1594_s8, [#allocation10]  }
 0x396   : > { %1309 = dma.done.wait (%p1090_p5), [#allocation10], 16  }
 0x397   : > { %1311 = vsyncadd (%p1090_p5), [#allocation10], 4294967280 }
 0x398   : > { %845 = sfence }
 0x399 PF: > { %s26_s29 = sadd.s32 1, %s1322_s29   ;;  %s1610_s27 = smov %s1318_s28 }
 0x39a   : > { %p23_p10 = scmp.ge.s32.totalorder %s26_s29, 4   ;;  %s1611_s28 = smov %s1613_s9 }
 0x39c   :  { %25 = sbr.rel (!%p23_p10) target bundleno = 7 (0x7), region = 130 }
 0x3a3   :  { %851 = vsyncpa [#allocation9], 1 }
 0x3a4   :  { %853 = vsyncpa [#allocation9 + $0x1], 1 }
 0x3a5   :  { %854 = vsyncpa [#allocation12], 1 }
 0x3a6   :  { %856 = vsyncpa [#allocation12 + $0x1], 1 }
 0x3a7   :  { %857 = vsyncpa [#allocation15], 1 }
 0x3a8   :  { %858 = vsyncpa [#allocation10], 1 }
 0x3a9   :  { %860 = vsyncpa [#allocation10 + $0x1], 1 }

</bundles_post_ra>
